<compile_context>
chip_gen: v6e
topology: v6e:2x2x1
jax: 0.10.0
libtpu: 0.0.40
codegen_flags: <defaults>
</compile_context>

<pallas_src>
import jax
import jax.numpy as jnp
from jax.experimental import pallas as pl
from jax.experimental.pallas import tpu as pltpu
import numpy as np

_HIGHEST = jax.lax.Precision.HIGHEST


# ---------------------------------------------------------------------------
# Kernel 1: fused (ReLU -> [CFM -> ReLU] x L) stack, channel-major layout.
# ---------------------------------------------------------------------------
def _cfm_stack_kernel(x_ref, w0_ref, b0_ref, w1_ref, b1_ref, out_ref):
    """x_ref / out_ref: (2C, TP) -- one batch element's channels x pixel tile.
    w0_ref: (L, 2C, C)   fused [scale_conv0 ; shift_conv0] weights
    b0_ref: (L, 2C, 1)
    w1_ref: (L, 2C, 2C)  block-diag [scale_conv1 0 ; 0 shift_conv1]
    b1_ref: (L, 2C, 1)
    """
    x = jnp.maximum(x_ref[...], 0.0)            # ReLU after in_conv (fused in)
    c = x.shape[0] // 2
    x0 = x[:c]                                  # modulated half
    x1 = x[c:]                                  # conditioning / passthrough half

    n_layers = w0_ref.shape[0]
    for l in range(n_layers):                   # static unroll; weights stay in VMEM
        # both branches' first 1x1 conv in one matmul: (2C,C) @ (C,TP)
        h = jnp.dot(w0_ref[l], x1, preferred_element_type=jnp.float32,
                    precision=_HIGHEST) + b0_ref[l]
        h = jnp.where(h >= 0.0, h, 0.1 * h)     # leaky_relu(0.1)
        # both branches' second 1x1 conv (block-diagonal): (2C,2C) @ (2C,TP)
        st = jnp.dot(w1_ref[l], h, preferred_element_type=jnp.float32,
                     precision=_HIGHEST) + b1_ref[l]
        scale = st[:c]
        shift = st[c:]
        # CFM modulation + the ReLU that follows each CFMLayer in hid_conv
        x0 = jnp.maximum(x0 * (scale + 1.0) + shift, 0.0)
        x1 = jnp.maximum(x1, 0.0)

    out_ref[:c, :] = x0
    out_ref[c:, :] = x1                          # passthrough written in-kernel


# ---------------------------------------------------------------------------
# Kernel 2: out_conv ReLU + global avg-pool + sigmoid + (a*x_in + 1 - a).
# ---------------------------------------------------------------------------
def _tail_kernel(y_ref, xin_ref, out_ref):
    """y_ref: (1, C_in, HW) pre-ReLU out_conv result for one batch element.
    xin_ref / out_ref: (1, C_in, HW) original input / final output."""
    y = jnp.maximum(y_ref[...], 0.0)             # ReLU after out_conv
    a = jnp.mean(y, axis=-1, keepdims=True)      # AdaptiveAvgPool2d((1,1))
    a = 1.0 / (1.0 + jnp.exp(-a))                # sigmoid
    out_ref[...] = a * xin_ref[...] + 1.0 - a


# ---------------------------------------------------------------------------
# Glue
# ---------------------------------------------------------------------------
def _pick_pixel_tile(hw_pad, max_tile=2048):
    tp = min(hw_pad, max_tile)
    tp -= tp % 128
    while hw_pad % tp:
        tp -= 128
    return tp


def cfm_stack_pallas(x_pre, cfm_packed, *, max_pixel_tile=2048):
    """x_pre: (N, 2C, H, W) pre-ReLU activations from in_conv."""
    n, c2, h, w = x_pre.shape
    assert c2 % 8 == 0, "channel count must be a multiple of 8 for sublane tiling"
    hw = h * w
    hw_pad = ((hw + 127) // 128) * 128            # lane-pad pixel axis if needed
    x_flat = x_pre.reshape(n * c2, hw)            # NCHW is already channel-major
    if hw_pad != hw:
        x_flat = jnp.pad(x_flat, ((0, 0), (0, hw_pad - hw)))
    tp = _pick_pixel_tile(hw_pad, max_pixel_tile)

    w0_all, b0_all, w1_all, b1_all = cfm_packed

    row_spec = pl.BlockSpec((c2, tp), lambda b, p: (b, p))

    def const_spec(shape):
        return pl.BlockSpec(shape, lambda b, p: (0,) * len(shape))

    out = pl.pallas_call(
        _cfm_stack_kernel,
        out_shape=jax.ShapeDtypeStruct((n * c2, hw_pad), jnp.float32),
        grid_spec=pltpu.PrefetchScalarGridSpec(
            num_scalar_prefetch=0,
            grid=(n, hw_pad // tp),
            in_specs=[row_spec,
                      const_spec(w0_all.shape), const_spec(b0_all.shape),
                      const_spec(w1_all.shape), const_spec(b1_all.shape)],
            out_specs=row_spec,
        ),
        compiler_params=pltpu.CompilerParams(
            dimension_semantics=("parallel", "parallel")),
    )(x_flat, w0_all, b0_all, w1_all, b1_all)

    if hw_pad != hw:
        out = out[:, :hw]
    return out.reshape(n, c2, h, w)


def atten_tail_pallas(y_pre, x_in):
    """y_pre: (N, C_in, H, W) pre-ReLU out_conv result; x_in: original input."""
    n, c, h, w = y_pre.shape
    hw = h * w
    y_r = y_pre.reshape(n, c, hw)
    x_r = x_in.reshape(n, c, hw)
    spec = pl.BlockSpec((1, c, hw), lambda b: (b, 0, 0))
    out = pl.pallas_call(
        _tail_kernel,
        out_shape=jax.ShapeDtypeStruct((n, c, hw), jnp.float32),
        grid_spec=pltpu.PrefetchScalarGridSpec(
            num_scalar_prefetch=0,
            grid=(n,),
            in_specs=[spec, spec],
            out_specs=spec,
        ),
        compiler_params=pltpu.CompilerParams(
            dimension_semantics=("parallel",)),
    )(y_r, x_r)
    return out.reshape(n, c, h, w)


def conv3x3(x, w, b):
    # TODO(synk): the two 3x3 spectral-norm convs are left to XLA's conv; a halo'd
    # im2col Pallas kernel for them is not implemented here.
    y = jax.lax.conv_general_dilated(
        x, w, window_strides=(1, 1), padding=((1, 1), (1, 1)),
        dimension_numbers=('NCHW', 'OIHW', 'NCHW'), precision=_HIGHEST)
    return y + b[None, :, None, None]


def atten_value_enh_pallas(x, params):
    (w_in, b_in), cfm_packed, (w_out, b_out) = params
    h = conv3x3(x, w_in, b_in)            # pre-ReLU; ReLU fused into CFM kernel
    h = cfm_stack_pallas(h, cfm_packed)   # ReLU + 3 x (CFM + ReLU)
    y = conv3x3(h, w_out, b_out)          # pre-ReLU; ReLU fused into tail kernel
    return atten_tail_pallas(y, x)        # ReLU + avgpool + sigmoid + a*x+1-a


# ---------------------------------------------------------------------------
# Parameters
# ---------------------------------------------------------------------------
def _spectral_normalize(w):
    """Exact spectral norm of a conv weight reshaped to (C_out, -1)."""
    mat = w.reshape(w.shape[0], -1)
    sigma = jnp.linalg.svd(mat, compute_uv=False)[0]
    return w / sigma


def make_params(key, c_in=3, c_hid=16, n_cfm=3):
    c = c_hid // 2
    keys = iter(jax.random.split(key, 2 * (2 + 4 * n_cfm)))

    def conv_wb(c_out, c_inn, k):
        wkey, bkey = next(keys), next(keys)
        w = 0.1 * jax.random.normal(wkey, (c_out, c_inn, k, k), jnp.float32)
        b = 0.1 * jax.random.normal(bkey, (c_out,), jnp.float32)
        return _spectral_normalize(w), b

    w_in, b_in = conv_wb(c_hid, c_in, 3)
    cfm_layers = []
    for _ in range(n_cfm):
        w0s, b0s = conv_wb(c, c, 1)
        w1s, b1s = conv_wb(c, c, 1)
        w0t, b0t = conv_wb(c, c, 1)
        w1t, b1t = conv_wb(c, c, 1)
        cfm_layers.append((w0s[:, :, 0, 0], b0s, w1s[:, :, 0, 0], b1s,
                           w0t[:, :, 0, 0], b0t, w1t[:, :, 0, 0], b1t))
    w_out, b_out = conv_wb(c_in, c_hid, 3)
    return (w_in, b_in), tuple(cfm_layers), (w_out, b_out)


def pack_cfm_weights(cfm_layers):
    """Done once at setup (not per forward): concatenate scale/shift conv0
    weights and block-diagonalise conv1 so each CFM layer is 2 matmuls."""
    w0_all, b0_all, w1_all, b1_all = [], [], [], []
    for (w0s, b0s, w1s, b1s, w0t, b0t, w1t, b1t) in cfm_layers:
        c = w0s.shape[0]
        w0_all.append(jnp.concatenate([w0s, w0t], axis=0))               # (2C, C)
        b0_all.append(jnp.concatenate([b0s, b0t], axis=0)[:, None])      # (2C, 1)
        w1 = jnp.zeros((2 * c, 2 * c), jnp.float32)
        w1 = w1.at[:c, :c].set(w1s).at[c:, c:].set(w1t)                  # block-diag
        w1_all.append(w1)
        b1_all.append(jnp.concatenate([b1s, b1t], axis=0)[:, None])
    return (jnp.stack(w0_all), jnp.stack(b0_all),
            jnp.stack(w1_all), jnp.stack(b1_all))


# ---------------------------------------------------------------------------
# Pure-JAX reference (mirrors the PyTorch forward)
# ---------------------------------------------------------------------------
def _cfm_layer_ref(x, layer):
    w0s, b0s, w1s, b1s, w0t, b0t, w1t, b1t = layer
    c = w0s.shape[0]
    x0, x1 = x[:, :c], x[:, c:]

    def conv1x1(v, wt, b):
        return (jnp.einsum('oc,nchw->nohw', wt, v, precision=_HIGHEST)
                + b[None, :, None, None])

    lrelu = lambda v: jnp.where(v >= 0.0, v, 0.1 * v)
    scale = conv1x1(lrelu(conv1x1(x1, w0s, b0s)), w1s, b1s)
    shift = conv1x1(lrelu(conv1x1(x1, w0t, b0t)), w1t, b1t)
    return jnp.concatenate([x0 * (scale + 1.0) + shift, x1], axis=1)


def atten_value_enh_ref(x, raw_params):
    (w_in, b_in), cfm_layers, (w_out, b_out) = raw_params
    h = jax.nn.relu(conv3x3(x, w_in, b_in))
    for layer in cfm_layers:
        h = jax.nn.relu(_cfm_layer_ref(h, layer))
    y = jax.nn.relu(conv3x3(h, w_out, b_out))
    a = jax.nn.sigmoid(jnp.mean(y, axis=(2, 3), keepdims=True))
    return a * x + 1.0 - a


if __name__ == "__main__":
    c_in, c_hid = 3, 16
    N, H, W = 2, 16, 16

    x = jax.random.normal(jax.random.PRNGKey(0), (N, c_in, H, W), jnp.float32)
    raw_params = make_params(jax.random.PRNGKey(1), c_in, c_hid)
    (w_in, b_in), cfm_layers, (w_out, b_out) = raw_params
    params = ((w_in, b_in), pack_cfm_weights(cfm_layers), (w_out, b_out))

    out = jax.jit(atten_value_enh_pallas)(x, params)
    out = jax.block_until_ready(out)

    ref = jax.block_until_ready(atten_value_enh_ref(x, raw_params))
    np.testing.assert_allclose(np.asarray(out), np.asarray(ref),
                               rtol=2e-4, atol=2e-4)
    print("KERNEL_OK")
</pallas_src>

<mosaic_0001>
module attributes {stable_mosaic.version = 11 : i64} {
  func.func @_cfm_stack_kernel(%arg0: i32, %arg1: i32, %arg2: memref<16x256xf32, #tpu.memory_space<vmem>>, %arg3: memref<3x16x8xf32, #tpu.memory_space<vmem>>, %arg4: memref<3x16x1xf32, #tpu.memory_space<vmem>>, %arg5: memref<3x16x16xf32, #tpu.memory_space<vmem>>, %arg6: memref<3x16x1xf32, #tpu.memory_space<vmem>>, %arg7: memref<16x256xf32, #tpu.memory_space<vmem>>) attributes {dimension_semantics = [#tpu.dimension_semantics<parallel>, #tpu.dimension_semantics<parallel>], iteration_bounds = array<i64: 2, 1>, scalar_prefetch = 0 : i64, scratch_operands = 0 : i64, tpu.core_type = #tpu.core_type<tc>, window_params = [{transform_indices = @transform_0, window_bounds = array<i64: 16, 256>}, {pipeline_mode = #tpu.pipeline_mode<synchronous>, transform_indices = @transform_1, window_bounds = array<i64: 3, 16, 8>}, {pipeline_mode = #tpu.pipeline_mode<synchronous>, transform_indices = @transform_2, window_bounds = array<i64: 3, 16, 1>}, {pipeline_mode = #tpu.pipeline_mode<synchronous>, transform_indices = @transform_3, window_bounds = array<i64: 3, 16, 16>}, {pipeline_mode = #tpu.pipeline_mode<synchronous>, transform_indices = @transform_4, window_bounds = array<i64: 3, 16, 1>}, {transform_indices = @transform_5, window_bounds = array<i64: 16, 256>}]} {
    %c0 = arith.constant 0 : index
    %c0_0 = arith.constant 0 : index
    %0 = vector.load %arg2[%c0, %c0_0] : memref<16x256xf32, #tpu.memory_space<vmem>>, vector<16x256xf32>
    %cst = arith.constant 0.000000e+00 : f32
    %1 = vector.broadcast %cst : f32 to vector<16x256xf32>
    %2 = arith.maximumf %0, %1 : vector<16x256xf32>
    %3 = vector.extract_strided_slice %2 {offsets = [0, 0], sizes = [8, 256], strides = [1, 1]} : vector<16x256xf32> to vector<8x256xf32>
    %4 = vector.extract_strided_slice %2 {offsets = [8, 0], sizes = [8, 256], strides = [1, 1]} : vector<16x256xf32> to vector<8x256xf32>
    %c0_1 = arith.constant 0 : index
    %c0_2 = arith.constant 0 : index
    %c0_3 = arith.constant 0 : index
    %5 = vector.load %arg3[%c0_1, %c0_2, %c0_3] : memref<3x16x8xf32, #tpu.memory_space<vmem>>, vector<1x16x8xf32>
    %6 = vector.shape_cast %5 : vector<1x16x8xf32> to vector<16x8xf32>
    %cst_4 = arith.constant dense<0.000000e+00> : vector<16x256xf32>
    %7 = tpu.matmul %6, %4, %cst_4 {dimension_numbers = #tpu.dot_dimension_numbers<[1], [0], [0], [1], [0, 0, 1, 1], [], []>, precision = #tpu.contract_precision<fp32>} : vector<16x8xf32>, vector<8x256xf32>, vector<16x256xf32> -> vector<16x256xf32>
    %c0_5 = arith.constant 0 : index
    %c0_6 = arith.constant 0 : index
    %c0_7 = arith.constant 0 : index
    %8 = vector.load %arg4[%c0_5, %c0_6, %c0_7] : memref<3x16x1xf32, #tpu.memory_space<vmem>>, vector<1x16x1xf32>
    %9 = vector.shape_cast %8 : vector<1x16x1xf32> to vector<16x1xf32>
    %10 = vector.broadcast %9 : vector<16x1xf32> to vector<16x256xf32>
    %11 = arith.addf %7, %10 : vector<16x256xf32>
    %cst_8 = arith.constant 0.000000e+00 : f32
    %12 = vector.broadcast %cst_8 : f32 to vector<16x256xf32>
    %13 = arith.cmpf oge, %11, %12 : vector<16x256xf32>
    %cst_9 = arith.constant 1.000000e-01 : f32
    %14 = vector.broadcast %cst_9 : f32 to vector<16x256xf32>
    %15 = arith.mulf %14, %11 : vector<16x256xf32>
    %16 = arith.select %13, %11, %15 : vector<16x256xi1>, vector<16x256xf32>
    %c0_10 = arith.constant 0 : index
    %c0_11 = arith.constant 0 : index
    %c0_12 = arith.constant 0 : index
    %17 = vector.load %arg5[%c0_10, %c0_11, %c0_12] : memref<3x16x16xf32, #tpu.memory_space<vmem>>, vector<1x16x16xf32>
    %18 = vector.shape_cast %17 : vector<1x16x16xf32> to vector<16x16xf32>
    %cst_13 = arith.constant dense<0.000000e+00> : vector<16x256xf32>
    %19 = tpu.matmul %18, %16, %cst_13 {dimension_numbers = #tpu.dot_dimension_numbers<[1], [0], [0], [1], [0, 0, 1, 1], [], []>, precision = #tpu.contract_precision<fp32>} : vector<16x16xf32>, vector<16x256xf32>, vector<16x256xf32> -> vector<16x256xf32>
    %c0_14 = arith.constant 0 : index
    %c0_15 = arith.constant 0 : index
    %c0_16 = arith.constant 0 : index
    %20 = vector.load %arg6[%c0_14, %c0_15, %c0_16] : memref<3x16x1xf32, #tpu.memory_space<vmem>>, vector<1x16x1xf32>
    %21 = vector.shape_cast %20 : vector<1x16x1xf32> to vector<16x1xf32>
    %22 = vector.broadcast %21 : vector<16x1xf32> to vector<16x256xf32>
    %23 = arith.addf %19, %22 : vector<16x256xf32>
    %24 = vector.extract_strided_slice %23 {offsets = [0, 0], sizes = [8, 256], strides = [1, 1]} : vector<16x256xf32> to vector<8x256xf32>
    %25 = vector.extract_strided_slice %23 {offsets = [8, 0], sizes = [8, 256], strides = [1, 1]} : vector<16x256xf32> to vector<8x256xf32>
    %cst_17 = arith.constant 1.000000e+00 : f32
    %26 = vector.broadcast %cst_17 : f32 to vector<8x256xf32>
    %27 = arith.addf %24, %26 : vector<8x256xf32>
    %28 = arith.mulf %3, %27 : vector<8x256xf32>
    %29 = arith.addf %28, %25 : vector<8x256xf32>
    %cst_18 = arith.constant 0.000000e+00 : f32
    %30 = vector.broadcast %cst_18 : f32 to vector<8x256xf32>
    %31 = arith.maximumf %29, %30 : vector<8x256xf32>
    %cst_19 = arith.constant 0.000000e+00 : f32
    %32 = vector.broadcast %cst_19 : f32 to vector<8x256xf32>
    %33 = arith.maximumf %4, %32 : vector<8x256xf32>
    %c1 = arith.constant 1 : index
    %c0_20 = arith.constant 0 : index
    %c0_21 = arith.constant 0 : index
    %34 = vector.load %arg3[%c1, %c0_20, %c0_21] : memref<3x16x8xf32, #tpu.memory_space<vmem>>, vector<1x16x8xf32>
    %35 = vector.shape_cast %34 : vector<1x16x8xf32> to vector<16x8xf32>
    %cst_22 = arith.constant dense<0.000000e+00> : vector<16x256xf32>
    %36 = tpu.matmul %35, %33, %cst_22 {dimension_numbers = #tpu.dot_dimension_numbers<[1], [0], [0], [1], [0, 0, 1, 1], [], []>, precision = #tpu.contract_precision<fp32>} : vector<16x8xf32>, vector<8x256xf32>, vector<16x256xf32> -> vector<16x256xf32>
    %c1_23 = arith.constant 1 : index
    %c0_24 = arith.constant 0 : index
    %c0_25 = arith.constant 0 : index
    %37 = vector.load %arg4[%c1_23, %c0_24, %c0_25] : memref<3x16x1xf32, #tpu.memory_space<vmem>>, vector<1x16x1xf32>
    %38 = vector.shape_cast %37 : vector<1x16x1xf32> to vector<16x1xf32>
    %39 = vector.broadcast %38 : vector<16x1xf32> to vector<16x256xf32>
    %40 = arith.addf %36, %39 : vector<16x256xf32>
    %cst_26 = arith.constant 0.000000e+00 : f32
    %41 = vector.broadcast %cst_26 : f32 to vector<16x256xf32>
    %42 = arith.cmpf oge, %40, %41 : vector<16x256xf32>
    %cst_27 = arith.constant 1.000000e-01 : f32
    %43 = vector.broadcast %cst_27 : f32 to vector<16x256xf32>
    %44 = arith.mulf %43, %40 : vector<16x256xf32>
    %45 = arith.select %42, %40, %44 : vector<16x256xi1>, vector<16x256xf32>
    %c1_28 = arith.constant 1 : index
    %c0_29 = arith.constant 0 : index
    %c0_30 = arith.constant 0 : index
    %46 = vector.load %arg5[%c1_28, %c0_29, %c0_30] : memref<3x16x16xf32, #tpu.memory_space<vmem>>, vector<1x16x16xf32>
    %47 = vector.shape_cast %46 : vector<1x16x16xf32> to vector<16x16xf32>
    %cst_31 = arith.constant dense<0.000000e+00> : vector<16x256xf32>
    %48 = tpu.matmul %47, %45, %cst_31 {dimension_numbers = #tpu.dot_dimension_numbers<[1], [0], [0], [1], [0, 0, 1, 1], [], []>, precision = #tpu.contract_precision<fp32>} : vector<16x16xf32>, vector<16x256xf32>, vector<16x256xf32> -> vector<16x256xf32>
    %c1_32 = arith.constant 1 : index
    %c0_33 = arith.constant 0 : index
    %c0_34 = arith.constant 0 : index
    %49 = vector.load %arg6[%c1_32, %c0_33, %c0_34] : memref<3x16x1xf32, #tpu.memory_space<vmem>>, vector<1x16x1xf32>
    %50 = vector.shape_cast %49 : vector<1x16x1xf32> to vector<16x1xf32>
    %51 = vector.broadcast %50 : vector<16x1xf32> to vector<16x256xf32>
    %52 = arith.addf %48, %51 : vector<16x256xf32>
    %53 = vector.extract_strided_slice %52 {offsets = [0, 0], sizes = [8, 256], strides = [1, 1]} : vector<16x256xf32> to vector<8x256xf32>
    %54 = vector.extract_strided_slice %52 {offsets = [8, 0], sizes = [8, 256], strides = [1, 1]} : vector<16x256xf32> to vector<8x256xf32>
    %cst_35 = arith.constant 1.000000e+00 : f32
    %55 = vector.broadcast %cst_35 : f32 to vector<8x256xf32>
    %56 = arith.addf %53, %55 : vector<8x256xf32>
    %57 = arith.mulf %31, %56 : vector<8x256xf32>
    %58 = arith.addf %57, %54 : vector<8x256xf32>
    %cst_36 = arith.constant 0.000000e+00 : f32
    %59 = vector.broadcast %cst_36 : f32 to vector<8x256xf32>
    %60 = arith.maximumf %58, %59 : vector<8x256xf32>
    %cst_37 = arith.constant 0.000000e+00 : f32
    %61 = vector.broadcast %cst_37 : f32 to vector<8x256xf32>
    %62 = arith.maximumf %33, %61 : vector<8x256xf32>
    %c2 = arith.constant 2 : index
    %c0_38 = arith.constant 0 : index
    %c0_39 = arith.constant 0 : index
    %63 = vector.load %arg3[%c2, %c0_38, %c0_39] : memref<3x16x8xf32, #tpu.memory_space<vmem>>, vector<1x16x8xf32>
    %64 = vector.shape_cast %63 : vector<1x16x8xf32> to vector<16x8xf32>
    %cst_40 = arith.constant dense<0.000000e+00> : vector<16x256xf32>
    %65 = tpu.matmul %64, %62, %cst_40 {dimension_numbers = #tpu.dot_dimension_numbers<[1], [0], [0], [1], [0, 0, 1, 1], [], []>, precision = #tpu.contract_precision<fp32>} : vector<16x8xf32>, vector<8x256xf32>, vector<16x256xf32> -> vector<16x256xf32>
    %c2_41 = arith.constant 2 : index
    %c0_42 = arith.constant 0 : index
    %c0_43 = arith.constant 0 : index
    %66 = vector.load %arg4[%c2_41, %c0_42, %c0_43] : memref<3x16x1xf32, #tpu.memory_space<vmem>>, vector<1x16x1xf32>
    %67 = vector.shape_cast %66 : vector<1x16x1xf32> to vector<16x1xf32>
    %68 = vector.broadcast %67 : vector<16x1xf32> to vector<16x256xf32>
    %69 = arith.addf %65, %68 : vector<16x256xf32>
    %cst_44 = arith.constant 0.000000e+00 : f32
    %70 = vector.broadcast %cst_44 : f32 to vector<16x256xf32>
    %71 = arith.cmpf oge, %69, %70 : vector<16x256xf32>
    %cst_45 = arith.constant 1.000000e-01 : f32
    %72 = vector.broadcast %cst_45 : f32 to vector<16x256xf32>
    %73 = arith.mulf %72, %69 : vector<16x256xf32>
    %74 = arith.select %71, %69, %73 : vector<16x256xi1>, vector<16x256xf32>
    %c2_46 = arith.constant 2 : index
    %c0_47 = arith.constant 0 : index
    %c0_48 = arith.constant 0 : index
    %75 = vector.load %arg5[%c2_46, %c0_47, %c0_48] : memref<3x16x16xf32, #tpu.memory_space<vmem>>, vector<1x16x16xf32>
    %76 = vector.shape_cast %75 : vector<1x16x16xf32> to vector<16x16xf32>
    %cst_49 = arith.constant dense<0.000000e+00> : vector<16x256xf32>
    %77 = tpu.matmul %76, %74, %cst_49 {dimension_numbers = #tpu.dot_dimension_numbers<[1], [0], [0], [1], [0, 0, 1, 1], [], []>, precision = #tpu.contract_precision<fp32>} : vector<16x16xf32>, vector<16x256xf32>, vector<16x256xf32> -> vector<16x256xf32>
    %c2_50 = arith.constant 2 : index
    %c0_51 = arith.constant 0 : index
    %c0_52 = arith.constant 0 : index
    %78 = vector.load %arg6[%c2_50, %c0_51, %c0_52] : memref<3x16x1xf32, #tpu.memory_space<vmem>>, vector<1x16x1xf32>
    %79 = vector.shape_cast %78 : vector<1x16x1xf32> to vector<16x1xf32>
    %80 = vector.broadcast %79 : vector<16x1xf32> to vector<16x256xf32>
    %81 = arith.addf %77, %80 : vector<16x256xf32>
    %82 = vector.extract_strided_slice %81 {offsets = [0, 0], sizes = [8, 256], strides = [1, 1]} : vector<16x256xf32> to vector<8x256xf32>
    %83 = vector.extract_strided_slice %81 {offsets = [8, 0], sizes = [8, 256], strides = [1, 1]} : vector<16x256xf32> to vector<8x256xf32>
    %cst_53 = arith.constant 1.000000e+00 : f32
    %84 = vector.broadcast %cst_53 : f32 to vector<8x256xf32>
    %85 = arith.addf %82, %84 : vector<8x256xf32>
    %86 = arith.mulf %60, %85 : vector<8x256xf32>
    %87 = arith.addf %86, %83 : vector<8x256xf32>
    %cst_54 = arith.constant 0.000000e+00 : f32
    %88 = vector.broadcast %cst_54 : f32 to vector<8x256xf32>
    %89 = arith.maximumf %87, %88 : vector<8x256xf32>
    %cst_55 = arith.constant 0.000000e+00 : f32
    %90 = vector.broadcast %cst_55 : f32 to vector<8x256xf32>
    %91 = arith.maximumf %62, %90 : vector<8x256xf32>
    %c0_56 = arith.constant 0 : index
    %c0_57 = arith.constant 0 : index
    %92 = vector.load %arg7[%c0_56, %c0_57] : memref<16x256xf32, #tpu.memory_space<vmem>>, vector<8x256xf32>
    tpu.vector_store %arg7[%c0_56, %c0_57], %89 {strides = array<i32>} : memref<16x256xf32, #tpu.memory_space<vmem>>, vector<8x256xf32>,
    %c8 = arith.constant 8 : index
    %c0_58 = arith.constant 0 : index
    %93 = vector.load %arg7[%c8, %c0_58] : memref<16x256xf32, #tpu.memory_space<vmem>>, vector<8x256xf32>
    tpu.vector_store %arg7[%c8, %c0_58], %91 {strides = array<i32>} : memref<16x256xf32, #tpu.memory_space<vmem>>, vector<8x256xf32>,
    return
  }
  func.func @transform_0(%arg0: i32, %arg1: i32) -> (i32, i32) {
    %c0_i32 = arith.constant 0 : i32
    return %arg0, %arg1 : i32, i32
  }
  func.func @transform_1(%arg0: i32, %arg1: i32) -> (i32, i32, i32) {
    %c0_i32 = arith.constant 0 : i32
    %c0_i32_0 = arith.constant 0 : i32
    %c0_i32_1 = arith.constant 0 : i32
    %c0_i32_2 = arith.constant 0 : i32
    return %c0_i32, %c0_i32_0, %c0_i32_1 : i32, i32, i32
  }
  func.func @transform_2(%arg0: i32, %arg1: i32) -> (i32, i32, i32) {
    %c0_i32 = arith.constant 0 : i32
    %c0_i32_0 = arith.constant 0 : i32
    %c0_i32_1 = arith.constant 0 : i32
    %c0_i32_2 = arith.constant 0 : i32
    return %c0_i32, %c0_i32_0, %c0_i32_1 : i32, i32, i32
  }
  func.func @transform_3(%arg0: i32, %arg1: i32) -> (i32, i32, i32) {
    %c0_i32 = arith.constant 0 : i32
    %c0_i32_0 = arith.constant 0 : i32
    %c0_i32_1 = arith.constant 0 : i32
    %c0_i32_2 = arith.constant 0 : i32
    return %c0_i32, %c0_i32_0, %c0_i32_1 : i32, i32, i32
  }
  func.func @transform_4(%arg0: i32, %arg1: i32) -> (i32, i32, i32) {
    %c0_i32 = arith.constant 0 : i32
    %c0_i32_0 = arith.constant 0 : i32
    %c0_i32_1 = arith.constant 0 : i32
    %c0_i32_2 = arith.constant 0 : i32
    return %c0_i32, %c0_i32_0, %c0_i32_1 : i32, i32, i32
  }
  func.func @transform_5(%arg0: i32, %arg1: i32) -> (i32, i32) {
    %c0_i32 = arith.constant 0 : i32
    return %arg0, %arg1 : i32, i32
  }
}

module attributes {stable_mosaic.version = 11 : i64} {
  func.func @_tail_kernel(%arg0: i32, %arg1: memref<1x3x256xf32, #tpu.memory_space<vmem>>, %arg2: memref<1x3x256xf32, #tpu.memory_space<vmem>>, %arg3: memref<1x3x256xf32, #tpu.memory_space<vmem>>) attributes {dimension_semantics = [#tpu.dimension_semantics<parallel>], iteration_bounds = array<i64: 2>, scalar_prefetch = 0 : i64, scratch_operands = 0 : i64, tpu.core_type = #tpu.core_type<tc>, window_params = [{transform_indices = @transform_0, window_bounds = array<i64: 1, 3, 256>}, {transform_indices = @transform_1, window_bounds = array<i64: 1, 3, 256>}, {transform_indices = @transform_2, window_bounds = array<i64: 1, 3, 256>}]} {
    %c0 = arith.constant 0 : index
    %c0_0 = arith.constant 0 : index
    %c0_1 = arith.constant 0 : index
    %0 = vector.load %arg1[%c0, %c0_0, %c0_1] : memref<1x3x256xf32, #tpu.memory_space<vmem>>, vector<1x3x256xf32>
    %cst = arith.constant 0.000000e+00 : f32
    %1 = vector.broadcast %cst : f32 to vector<1x3x256xf32>
    %2 = arith.maximumf %0, %1 : vector<1x3x256xf32>
    %cst_2 = arith.constant dense<0.000000e+00> : vector<1x3xf32>
    %3 = vector.multi_reduction <add>, %2, %cst_2 [2] : vector<1x3x256xf32> to vector<1x3xf32>
    %4 = vector.shape_cast %3 : vector<1x3xf32> to vector<1x3x1xf32>
    %cst_3 = arith.constant 2.560000e+02 : f32
    %5 = vector.broadcast %cst_3 : f32 to vector<1x3x1xf32>
    %6 = arith.divf %4, %5 : vector<1x3x1xf32>
    %cst_4 = arith.constant 0.000000e+00 : f32
    %7 = vector.broadcast %cst_4 : f32 to vector<1x3x1xf32>
    %8 = arith.subf %7, %6 : vector<1x3x1xf32>
    %9 = math.exp %8 : vector<1x3x1xf32>
    %cst_5 = arith.constant 1.000000e+00 : f32
    %10 = vector.broadcast %cst_5 : f32 to vector<1x3x1xf32>
    %11 = arith.addf %10, %9 : vector<1x3x1xf32>
    %cst_6 = arith.constant 1.000000e+00 : f32
    %12 = vector.broadcast %cst_6 : f32 to vector<1x3x1xf32>
    %13 = arith.divf %12, %11 : vector<1x3x1xf32>
    %c0_7 = arith.constant 0 : index
    %c0_8 = arith.constant 0 : index
    %c0_9 = arith.constant 0 : index
    %14 = vector.load %arg2[%c0_7, %c0_8, %c0_9] : memref<1x3x256xf32, #tpu.memory_space<vmem>>, vector<1x3x256xf32>
    %15 = vector.broadcast %13 : vector<1x3x1xf32> to vector<1x3x256xf32>
    %16 = arith.mulf %15, %14 : vector<1x3x256xf32>
    %cst_10 = arith.constant 1.000000e+00 : f32
    %17 = vector.broadcast %cst_10 : f32 to vector<1x3x256xf32>
    %18 = arith.addf %16, %17 : vector<1x3x256xf32>
    %19 = vector.broadcast %13 : vector<1x3x1xf32> to vector<1x3x256xf32>
    %20 = arith.subf %18, %19 : vector<1x3x256xf32>
    %c0_11 = arith.constant 0 : index
    %c0_12 = arith.constant 0 : index
    %c0_13 = arith.constant 0 : index
    %21 = vector.load %arg3[%c0_11, %c0_12, %c0_13] : memref<1x3x256xf32, #tpu.memory_space<vmem>>, vector<1x3x256xf32>
    tpu.vector_store %arg3[%c0_11, %c0_12, %c0_13], %20 {strides = array<i32>} : memref<1x3x256xf32, #tpu.memory_space<vmem>>, vector<1x3x256xf32>,
    return
  }
  func.func @transform_0(%arg0: i32) -> (i32, i32, i32) {
    %c0_i32 = arith.constant 0 : i32
    %c0_i32_0 = arith.constant 0 : i32
    %c0_i32_1 = arith.constant 0 : i32
    return %arg0, %c0_i32, %c0_i32_0 : i32, i32, i32
  }
  func.func @transform_1(%arg0: i32) -> (i32, i32, i32) {
    %c0_i32 = arith.constant 0 : i32
    %c0_i32_0 = arith.constant 0 : i32
    %c0_i32_1 = arith.constant 0 : i32
    return %arg0, %c0_i32, %c0_i32_0 : i32, i32, i32
  }
  func.func @transform_2(%arg0: i32) -> (i32, i32, i32) {
    %c0_i32 = arith.constant 0 : i32
    %c0_i32_0 = arith.constant 0 : i32
    %c0_i32_1 = arith.constant 0 : i32
    return %arg0, %c0_i32, %c0_i32_0 : i32, i32, i32
  }
}

</mosaic_0001>

<bundles_post_ra>
// kernel: atten_value_enh_pallas.2
= control target key start
LH: loop header
LB: loop body
LE: loop exit
PB: predicated region body
PF: predicated region fallthrough
CT: control target
= control target key end

     0   :  { %s3847_s18 = smov 0   ;;  %s3849_s19 = smov 0   ;;  %s4306_s0 = inlined_call_operand.vmem [shape: f32[32,256], index: 0, kind: input, shape index: {}]   ;;  %s4307_s1 = inlined_call_operand.vmem [shape: f32[3,16,8], index: 1, kind: input, shape index: {}]   ;;  %s4308_s2 = inlined_call_operand.vmem [shape: f32[3,16,1], index: 2, kind: input, shape index: {}]   ;;  %s4309_s3 = inlined_call_operand.vmem [shape: f32[3,16,16], index: 3, kind: input, shape index: {}]   ;;  %s4310_s4 = inlined_call_operand.vmem [shape: f32[3,16,1], index: 4, kind: input, shape index: {}]   ;;  %s4311_s5 = inlined_call_operand.vmem [shape: f32[32,256], index: 5, kind: output, shape index: {}]  }
   0x1   :  { %s3851_s20 = smov 0  }
   0x2 LB: > { %s27_s21 = sadd.s32 1, %s3809_s19  ;;  %p3736_p0 = scmp.ge.s32.totalorder %s3813_s20, 1  ;;  %s3813_s20 = sphi %s3851_s20, %s15_s20   ;;  %s3809_s19 = sphi %s3849_s19, %s4313_s19   ;;  %s3805_s18 = sphi %s3847_s18, %s4312_s18  }
   0x3   : > { %p29_p1 = scmp.ge.s32.totalorder %s27_s21, 2  ;;  %p210_p2 = scmp.lt.s32.totalorder %s3813_s20, 3 }
   0x5   : > { %s4315_s21 = smov (%p29_p1, %s27_s21), 0  ;;  %p211_p3 = pnand %p3736_p0, %p210_p2 }
   0x6   : > { %s3737_s22 = sshll.u32 (!%p211_p3), %s3805_s18, 1 }
   0x7   : > { %214 = sbr.rel (%p211_p3) target bundleno = 1006 (0x3ee), region = 40  ;;  %p250_p4 = scmp.lt.s32.totalorder (!%p211_p3), %s3737_s22, 3 }
   0xc   : > { %v280_v0 = vld [vmem:[%s4307_s1] sm:$0xff]  ;;  %vm294_vm0 = vcmask 64512   ;;  %v281_v1 = vld [vmem:[%s4307_s1 + $0x8] sm:$0xff]  ;;  %v3815_v2 = vmov 0.0   ;;  %v3816_v8 = vmov 0   ;;  %s4317_s22 = smov (!%p250_p4, %s3737_s22), 3 }
   0xd   : > { %367 = vmatprep.mubr.f32.mxu0 %v3815_v2  ;;  %v296_v3 = vsel %vm294_vm0, %v280_v0, 0  ;;  %v299_v4 = vsel %vm294_vm0, %v281_v1, 0  ;;  %464 = vmatprep.mubr.f32.mxu1 %v3815_v2  ;;  %v283_v5 = vld [vmem:[%s4308_s2 + $0x8] sm:$0xff]  ;;  %v282_v11 = vld [vmem:[%s4308_s2] sm:$0xff]  ;;  %s3761_s6 = sshll.u32 %s4317_s22, 4  ;;  %v3749_v32 = vld [vmem:[%s4310_s4 + $0x10] sm:$0xff] }
   0xe   : > { %v3878_v6 = vand.u32 4294901760, %v296_v3  ;;  %v3880_v7 = vand.u32 4294901760, %v299_v4  ;;  %3789 = vset.pattern.permute.xlu0 %v3816_v8  ;;  %3790 = vset.pattern.permute.xlu1 %v3816_v8  ;;  %s3895_s9 = scalar_lea.vmem %s4306_s0, %s3761_s6  ;;  %v3754_v19 = vld [vmem:[%s4308_s2 + $0x28] sm:$0xff]  ;;  %v829_v26 = vld [vmem:[%s4310_s4] sm:$0xff]  ;;  %v3746_v36 = vld [vmem:[%s4308_s2 + $0x18] sm:$0xff]  ;;  %vm841_vm1 = vcmask 130048   ;;  %s269_s13 = scalar_lea.vmem %s4311_s5, %s3761_s6 }
   0xf   : > { %291 = vperm.xlu0 %3789, %v283_v5   ;;  %v275_v14 = vld [vmem:[%s3895_s9 + $0x18] sm:$0xff]  ;;  %v274_v15 = vld [vmem:[%s3895_s9 + $0x10] sm:$0xff]  ;;  %v3757_v35 = vld [vmem:[%s4310_s4 + $0x20] sm:$0xff]  ;;  %1411 = vperm.xlu1 %3790, %v3746_v36  }
  0x10   : > { %v369_v9 = vsub.f32 %v296_v3, %v3878_v6  ;;  %v380_v10 = vsub.f32 %v299_v4, %v3880_v7  ;;  %v3899_v16 = vmax.f32 %v275_v14, 0.0  ;;  %v3901_v17 = vmax.f32 %v274_v15, 0.0  ;;  %v3745_v37 = vld [vmem:[%s4308_s2 + $0x10] sm:$0xff]  ;;  %v3753_v38 = vld [vmem:[%s4308_s2 + $0x20] sm:$0xff]  ;;  %v830_v39 = vld [vmem:[%s4310_s4 + $0x8] sm:$0xff] }
  0x11   : > { %v3750_v40 = vld [vmem:[%s4310_s4 + $0x18] sm:$0xff]  ;;  %v3758_v41 = vld [vmem:[%s4310_s4 + $0x28] sm:$0xff]  ;;  %v827_v60 = vld [vmem:[%s4309_s3] sm:$0xff] }
  0x12   : > { %v370_v12 = vand.u32 4294901760, %v369_v9  ;;  %v381_v13 = vand.u32 4294901760, %v380_v10  ;;  %v331_v20 = vand.u32 4294901760, %v3899_v16  ;;  %v333_v21 = vand.u32 4294901760, %v3901_v17 }
  0x13   : > { %286 = vperm.xlu0 %3789, %v282_v11   ;;  %1406 = vperm.xlu1 %3790, %v3745_v37   ;;  %v843_v4 = vsel %vm841_vm1, %v827_v60, 0 }
  0x14   : > { %v371_v18 = vsub.f32 %v369_v9, %v370_v12  ;;  %v382_v23 = vsub.f32 %v380_v10, %v381_v13  ;;  %332 = vmatprep.subr.mxu0 %v331_v20  ;;  %v421_v24 = vsub.f32 %v3899_v16, %v331_v20  ;;  %v427_v25 = vsub.f32 %v3901_v17, %v333_v21 }
  0x15   : > { %334 = vmatpush1.msra.mxu0 %v333_v21  ;;  %v3959_v11 = vand.u32 4294901760, %v843_v4 }
  0x16   : > { %v372_v22 = vand.u32 4294901760, %v371_v18  ;;  %v383_v27 = vand.u32 4294901760, %v382_v23  ;;  %v422_v28 = vand.u32 4294901760, %v421_v24  ;;  %v428_v29 = vand.u32 4294901760, %v427_v25  ;;  %511 = vmatprep.subr.mxu0 %v421_v24 }
  0x17   : > { %2531 = vperm.xlu0 %3789, %v3754_v19   ;;  %2526 = vperm.xlu1 %3790, %v3753_v38  }
  0x18   : > { %373 = vmatmul.mubr.f32.vlgmr.msra.gmra.mxu0 %v372_v22  ;;  %v423_v30 = vsub.f32 %v421_v24, %v422_v28  ;;  %v429_v31 = vsub.f32 %v427_v25, %v428_v29 }
  0x19   : > { %378 = vmatprep.mubr.f32.mxu0 %v3815_v2  ;;  %514 = vmatpush1.msra.mxu0 %v427_v25  ;;  %v3966_v25 = vsub.f32 %v843_v4, %v3959_v11 }
  0x1a   : > { %682 = vmatprep.subr.mxu0 %v422_v28  ;;  %v424_v33 = vand.u32 4294901760, %v423_v30  ;;  %v430_v34 = vand.u32 4294901760, %v429_v31 }
  0x1b   : > { %833 = vperm.xlu0 %3789, %v829_v26   ;;  %838 = vperm.xlu1 %3790, %v830_v39   ;;  %v919_v36 = vand.u32 4294901760, %v3966_v25 }
  0x1c   : > { %384 = vmatmul.mubr.f32.gmra.mxu0 %v383_v27  ;;  %425 = vmatprep.subr.mxu1 %v424_v33 }
  0x1d   : > { %547 = vmatprep.mubr.f32.mxu0 %v3815_v2  ;;  %431 = vmatpush1.msra.mxu1 %v430_v34 }
  0x1e   : > { %466 = vmatmul.mubr.f32.vlgmr.msra.gmra.mxu1 %v3878_v6  ;;  %595 = vmatprep.subr.mxu1 %v331_v20 }
  0x1f   : > { %1954 = vperm.xlu0 %3789, %v3749_v32   ;;  %471 = vmatprep.mubr.f32.mxu1 %v3815_v2 }
  0x20   : > { %550 = vmatmul.mubr.f32.vlgmr.msra.gmra.mxu0 %v369_v9  ;;  %597 = vmatpush1.msra.mxu1 %v333_v21 }
  0x21   : > { %555 = vmatprep.mubr.f32.mxu0 %v3815_v2  ;;  %686 = vmatpush1.msra.mxu0 %v428_v29 }
  0x22   : > { %765 = vmatprep.subr.mxu1 %v331_v20  ;;  %473 = vmatmul.mubr.f32.gmra.mxu1 %v3880_v7 }
  0x23   : > { %630 = vmatprep.mubr.f32.mxu1 %v3815_v2  ;;  %3074 = vperm.xlu0 %3789, %v3757_v35  }
  0x24   : > { %558 = vmatmul.mubr.f32.gmra.mxu0 %v380_v10  ;;  %1959 = vperm.xlu1 %3790, %v3750_v40  }
  0x25   : > { %719 = vmatprep.mubr.f32.mxu0 %v3815_v2 }
  0x26   : > { %634 = vmatmul.mubr.f32.vlgmr.msra.gmra.mxu1 %v370_v12  ;;  %v828_v12 = vld [vmem:[%s4309_s3 + $0x8] sm:$0xff] }
  0x27   : > { %639 = vmatprep.mubr.f32.mxu1 %v3815_v2  ;;  %767 = vmatpush1.msra.mxu1 %v333_v21  ;;  %v846_v22 = vsel %vm841_vm1, %v828_v12, 0 }
  0x28   : > { %721 = vmatmul.mubr.f32.vlgmr.msra.gmra.mxu0 %v3878_v6  ;;  %3079 = vperm.xlu1 %3790, %v3758_v41   ;;  %v3968_v30 = vand.u32 4294901760, %v846_v22 }
  0x29   : > { %726 = vmatprep.mubr.f32.mxu0 %v3815_v2 }
  0x2a   : > { %643 = vmatmul.mubr.f32.gmra.mxu1 %v381_v13 }
  0x2b   : > { %800 = vmatprep.mubr.f32.mxu1 %v3815_v2 }
  0x2c   : > { %728 = vmatmul.mubr.f32.gmra.mxu0 %v3880_v7 }
  0x2d   : > { %916 = vmatprep.mubr.f32.mxu0 %v3815_v2 }
  0x2e   : > { %802 = vmatmul.mubr.f32.vlgmr.msra.gmra.mxu1 %v3878_v6 }
  0x2f   : > { %807 = vmatprep.mubr.f32.mxu1 %v3815_v2 }
  0x32   : > { %809 = vmatmul.mubr.f32.gmra.mxu1 %v3880_v7 }
  0x33   : > { %1023 = vmatprep.mubr.f32.mxu1 %v3815_v2 }
  0x8a   : > { %v292_v43 = vpop.permute.xlu0 %291 }
  0x8e   : > { %v287_v47 = vpop.permute.xlu0 %286 }
  0xd8   : > { %v374_v42 = vpop.f32.mrf.mxu0 }
  0xd9   : > { %v375_v50 = vadd.f32 %v374_v42, %v287_v47  ;;  %v3974_v42 = vsub.f32 %v846_v22, %v3968_v30 }
  0xda   : > { %v376_v44 = vpop.f32.mrf.mxu0 }
  0xdb   : > { %v377_v55 = vadd.f32 %v376_v44, %v287_v47 }
  0xdc   : > { %v385_v45 = vpop.f32.mrf.mxu0 }
  0xdd   : > { %v386_v56 = vadd.f32 %v385_v45, %v292_v43 }
  0xde   : > { %v387_v46 = vpop.f32.mrf.mxu0  ;;  %v467_v48 = vpop.f32.mrf.mxu1 }
  0xdf   : > { %v468_v57 = vadd.f32 %v467_v48, %v375_v50  ;;  %v388_v62 = vadd.f32 %v387_v46, %v292_v43 }
  0xe0   : > { %v551_v49 = vpop.f32.mrf.mxu0  ;;  %v469_v51 = vpop.f32.mrf.mxu1 }
  0xe1   : > { %v470_v61 = vadd.f32 %v469_v51, %v377_v55  ;;  %v552_v1 = vadd.f32 %v551_v49, %v468_v57  ;;  %v920_v49 = vsub.f32 %v3966_v25, %v919_v36 }
  0xe2   : > { %v553_v52 = vpop.f32.mrf.mxu0  ;;  %v474_v53 = vpop.f32.mrf.mxu1 }
  0xe3   : > { %v475_v3 = vadd.f32 %v474_v53, %v386_v56  ;;  %v554_v8 = vadd.f32 %v553_v52, %v470_v61  ;;  %v930_v52 = vand.u32 4294901760, %v3974_v42  ;;  %v921_v57 = vand.u32 4294901760, %v920_v49 }
  0xe4   : > { %v559_v54 = vpop.f32.mrf.mxu0  ;;  %v476_v58 = vpop.f32.mrf.mxu1 }
  0xe5   : > { %v477_v5 = vadd.f32 %v476_v58, %v388_v62  ;;  %v560_v13 = vadd.f32 %v559_v54, %v475_v3 }
  0xe6   : > { %v561_v59 = vpop.f32.mrf.mxu0  ;;  %v635_v63 = vpop.f32.mrf.mxu1 }
  0xe7   : > { %v636_v9 = vadd.f32 %v635_v63, %v552_v1  ;;  %v562_v18 = vadd.f32 %v561_v59, %v477_v5  ;;  %v931_v59 = vsub.f32 %v3974_v42, %v930_v52 }
  0xe8   : > { %v722_v0 = vpop.f32.mrf.mxu0  ;;  %v637_v6 = vpop.f32.mrf.mxu1 }
  0xe9   : > { %v638_v14 = vadd.f32 %v637_v6, %v554_v8  ;;  %v723_v20 = vadd.f32 %v722_v0, %v636_v9  ;;  %v3993_v0 = vmax.f32 %v3899_v16, 0.0  ;;  %v932_v3 = vand.u32 4294901760, %v931_v59 }
  0xea   : > { %v724_v7 = vpop.f32.mrf.mxu0  ;;  %v644_v10 = vpop.f32.mrf.mxu1  ;;  %v4004_v9 = vmax.f32 %v3901_v17, 0.0 }
  0xeb   : > { %v645_v21 = vadd.f32 %v644_v10, %v560_v13  ;;  %v725_v26 = vadd.f32 %v724_v7, %v638_v14  ;;  %v3743_v7 = vld [vmem:[%s4307_s1 + $0x10] sm:$0xff]  ;;  %v4001_v16 = vand.u32 4294901760, %v3993_v0 }
  0xec   : > { %v729_v15 = vpop.f32.mrf.mxu0  ;;  %v646_v19 = vpop.f32.mrf.mxu1  ;;  %v1415_v13 = vsel %vm294_vm0, %v3743_v7, 0  ;;  %v4012_v17 = vand.u32 4294901760, %v4004_v9 }
  0xed   : > { %v647_v23 = vadd.f32 %v646_v19, %v562_v18  ;;  %v730_v31 = vadd.f32 %v729_v15, %v645_v21  ;;  %v3744_v15 = vld [vmem:[%s4307_s1 + $0x18] sm:$0xff]  ;;  %v1540_v18 = vsub.f32 %v3993_v0, %v4001_v16  ;;  %v4016_v19 = vand.u32 4294901760, %v1415_v13 }
  0xee   : > { %v803_v24 = vpop.f32.mrf.mxu1  ;;  %v731_v27 = vpop.f32.mrf.mxu0  ;;  %v1546_v22 = vsub.f32 %v4004_v9, %v4012_v17 }
  0xef   : > { %v804_v28 = vadd.f32 %v803_v24, %v723_v20  ;;  %v732_v34 = vadd.f32 %v731_v27, %v647_v23  ;;  %v1418_v20 = vsel %vm294_vm0, %v3744_v15, 0  ;;  %v1541_v21 = vand.u32 4294901760, %v1540_v18 }
  0xf0   : > { %v805_v29 = vpop.f32.mrf.mxu1  ;;  %v1488_v23 = vsub.f32 %v1415_v13, %v4016_v19  ;;  %v4026_v24 = vand.u32 4294901760, %v1418_v20  ;;  %v1547_v27 = vand.u32 4294901760, %v1546_v22 }
  0xf1   : > { %vm815_vm2 = vcmp.ge.f32.partialorder %v804_v28, 0.0  ;;  %v819_v32 = vmul.f32 0.1, %v804_v28  ;;  %v806_v33 = vadd.f32 %v805_v29, %v725_v26  ;;  %v1542_v26 = vsub.f32 %v1540_v18, %v1541_v21 }
  0xf2   : > { %v810_v35 = vpop.f32.mrf.mxu1  ;;  %v1499_v29 = vsub.f32 %v1418_v20, %v4026_v24 }
  0xf3   : > { %v823_v37 = vsel %vm815_vm2, %v804_v28, %v819_v32  ;;  %vm816_vm3 = vcmp.ge.f32.partialorder %v806_v33, 0.0  ;;  %v820_v38 = vmul.f32 0.1, %v806_v33  ;;  %v811_v39 = vadd.f32 %v810_v35, %v730_v31 }
  0xf4   : > { %v3971_v40 = vand.u32 4294901760, %v823_v37  ;;  %v812_v41 = vpop.f32.mrf.mxu1  ;;  %v1489_v28 = vand.u32 4294901760, %v1488_v23  ;;  %v1543_v31 = vand.u32 4294901760, %v1542_v26  ;;  %v1548_v32 = vsub.f32 %v1546_v22, %v1547_v27 }
  0xf5   : > { %v824_v43 = vsel %vm816_vm3, %v806_v33, %v820_v38  ;;  %vm817_vm4 = vcmp.ge.f32.partialorder %v811_v39, 0.0  ;;  %v821_v44 = vmul.f32 0.1, %v811_v39  ;;  %v813_v45 = vadd.f32 %v812_v41, %v732_v34  ;;  %v4081_v38 = vpop.permute.xlu0 %2531 }
  0xf6   : > { %v3976_v46 = vand.u32 4294901760, %v824_v43  ;;  %v986_v53 = vsub.f32 %v823_v37, %v3971_v40  ;;  %v1490_v33 = vsub.f32 %v1488_v23, %v1489_v28  ;;  %v1500_v34 = vand.u32 4294901760, %v1499_v29 }
  0xf7   : > { %v825_v47 = vsel %vm817_vm4, %v811_v39, %v821_v44  ;;  %vm818_vm5 = vcmp.ge.f32.partialorder %v813_v45, 0.0  ;;  %v822_v48 = vmul.f32 0.1, %v813_v45 }
  0xf8   : > { %v3981_v50 = vand.u32 4294901760, %v825_v47  ;;  %v980_v51 = vsub.f32 %v824_v43, %v3976_v46  ;;  %v987_v62 = vand.u32 4294901760, %v986_v53  ;;  %v1491_v35 = vand.u32 4294901760, %v1490_v33 }
  0xf9   : > { %v826_v54 = vsel %vm818_vm5, %v813_v45, %v822_v48  ;;  %v834_v43 = vpop.permute.xlu0 %833 }
  0xfa   : > { %v974_v55 = vsub.f32 %v825_v47, %v3981_v50  ;;  %v876_v56 = vand.u32 4294901760, %v826_v54  ;;  %v981_v61 = vand.u32 4294901760, %v980_v51  ;;  %v988_v6 = vsub.f32 %v986_v53, %v987_v62 }
  0xfc   : > { %877 = vmatprep.subr.mxu0 %v876_v56  ;;  %v968_v58 = vsub.f32 %v826_v54, %v876_v56  ;;  %v975_v60 = vand.u32 4294901760, %v974_v55  ;;  %v982_v5 = vsub.f32 %v980_v51, %v981_v61  ;;  %v989_v14 = vand.u32 4294901760, %v988_v6 }
  0xfd   : > { %879 = vmatpush1.msra.mxu0 %v3981_v50 }
  0xfe   : > { %881 = vmatprep.subr.mxu0 %v3976_v46  ;;  %v969_v63 = vand.u32 4294901760, %v968_v58  ;;  %v976_v1 = vsub.f32 %v974_v55, %v975_v60  ;;  %v983_v12 = vand.u32 4294901760, %v982_v5 }
  0xff   : > { %883 = vmatpush1.msra.mxu0 %v3971_v40 }
 0x100   : > { %922 = vmatmul.mubr.f32.vlgmr.msra.gmra.mxu0 %v921_v57  ;;  %1068 = vmatprep.subr.mxu0 %v968_v58  ;;  %v970_v4 = vsub.f32 %v968_v58, %v969_v63  ;;  %v977_v10 = vand.u32 4294901760, %v976_v1 }
 0x101   : > { %1071 = vmatpush1.msra.mxu0 %v974_v55  ;;  %927 = vmatprep.mubr.f32.mxu0 %v3815_v2 }
 0x102   : > { %1074 = vmatprep.subr.mxu0 %v980_v51  ;;  %v971_v8 = vand.u32 4294901760, %v970_v4 }
 0x103   : > { %1077 = vmatpush1.msra.mxu0 %v986_v53 }
 0x104   : > { %933 = vmatmul.mubr.f32.gmra.mxu0 %v932_v3  ;;  %972 = vmatprep.subr.mxu1 %v971_v8 }
 0x105   : > { %1245 = vmatprep.subr.mxu0 %v969_v63  ;;  %978 = vmatpush1.msra.mxu1 %v977_v10 }
 0x106   : > { %984 = vmatprep.subr.mxu1 %v983_v12  ;;  %1110 = vmatprep.mubr.f32.mxu0 %v3815_v2 }
 0x107   : > { %990 = vmatpush1.msra.mxu1 %v989_v14 }
 0x108   : > { %1025 = vmatmul.mubr.f32.vlgmr.msra.gmra.mxu1 %v3959_v11  ;;  %1113 = vmatmul.mubr.f32.vlgmr.msra.gmra.mxu0 %v3966_v25  ;;  %v1549_v25 = vand.u32 4294901760, %v1548_v32 }
 0x109   : > { %1156 = vmatprep.subr.mxu1 %v876_v56  ;;  %1249 = vmatpush1.msra.mxu0 %v975_v60 }
 0x10a   : > { %1158 = vmatpush1.msra.mxu1 %v3981_v50  ;;  %1253 = vmatprep.subr.mxu0 %v981_v61 }
 0x10b   : > { %1160 = vmatprep.subr.mxu1 %v3976_v46  ;;  %1257 = vmatpush1.msra.mxu0 %v987_v62 }
 0x10c   : > { %1030 = vmatprep.mubr.f32.mxu1 %v3815_v2  ;;  %1162 = vmatpush1.msra.mxu1 %v3971_v40 }
 0x10d   : > { %1032 = vmatmul.mubr.f32.gmra.mxu1 %v3968_v30  ;;  %1334 = vmatprep.subr.mxu1 %v876_v56 }
 0x10e   : > { %1118 = vmatprep.mubr.f32.mxu0 %v3815_v2  ;;  %1195 = vmatprep.mubr.f32.mxu1 %v3815_v2 }
 0x10f   : > { %1121 = vmatmul.mubr.f32.gmra.mxu0 %v3974_v42  ;;  %1451 = vmatprep.subr.mxu0 %v4001_v16 }
 0x110   : > { %1290 = vmatprep.mubr.f32.mxu0 %v3815_v2 }
 0x111   : > { %1199 = vmatmul.mubr.f32.vlgmr.msra.gmra.mxu1 %v919_v36  ;;  %v1501_v36 = vsub.f32 %v1499_v29, %v1500_v34 }
 0x112   : > { %1336 = vmatpush1.msra.mxu1 %v3981_v50  ;;  %1204 = vmatprep.mubr.f32.mxu1 %v3815_v2 }
 0x113   : > { %1338 = vmatprep.subr.mxu1 %v3976_v46  ;;  %1292 = vmatmul.mubr.f32.vlgmr.msra.gmra.mxu0 %v3959_v11  ;;  %v1502_v37 = vand.u32 4294901760, %v1501_v36 }
 0x114   : > { %1340 = vmatpush1.msra.mxu1 %v3971_v40  ;;  %1297 = vmatprep.mubr.f32.mxu0 %v3815_v2 }
 0x115   : > { %1208 = vmatmul.mubr.f32.gmra.mxu1 %v930_v52  ;;  %1453 = vmatpush1.msra.mxu0 %v4012_v17 }
 0x116   : > { %1373 = vmatprep.mubr.f32.mxu1 %v3815_v2  ;;  %1544 = vmatprep.subr.mxu1 %v1543_v31 }
 0x117   : > { %1299 = vmatmul.mubr.f32.gmra.mxu0 %v3968_v30  ;;  %1630 = vmatprep.subr.mxu0 %v1540_v18  ;;  %v272_v18 = vld [vmem:[%s3895_s9] sm:$0xff] }
 0x118   : > { %1486 = vmatprep.mubr.f32.mxu0 %v3815_v2  ;;  %v276_v26 = vmax.f32 %v272_v18, 0.0 }
 0x119   : > { %1375 = vmatmul.mubr.f32.vlgmr.msra.gmra.mxu1 %v3959_v11  ;;  %v4077_v11 = vpop.permute.xlu1 %1411 }
 0x11a   : > { %1380 = vmatprep.mubr.f32.mxu1 %v3815_v2  ;;  %1550 = vmatpush1.msra.mxu1 %v1549_v25 }
 0x11b   : > { %1492 = vmatmul.mubr.f32.vlgmr.msra.gmra.mxu0 %v1491_v35  ;;  %1714 = vmatprep.subr.mxu1 %v4001_v16 }
 0x11c   : > { %1497 = vmatprep.mubr.f32.mxu0 %v3815_v2  ;;  %1633 = vmatpush1.msra.mxu0 %v1546_v22 }
 0x11d   : > { %1382 = vmatmul.mubr.f32.gmra.mxu1 %v3968_v30  ;;  %1801 = vmatprep.subr.mxu0 %v1541_v21  ;;  %v4079_v30 = vpop.permute.xlu1 %1406 }
 0x11e   : > { %1583 = vmatprep.mubr.f32.mxu1 %v3815_v2 }
 0x11f   : > { %1503 = vmatmul.mubr.f32.gmra.mxu0 %v1502_v37 }
 0x120   : > { %1666 = vmatprep.mubr.f32.mxu0 %v3815_v2 }
 0x121   : > { %1585 = vmatmul.mubr.f32.vlgmr.msra.gmra.mxu1 %v4016_v19  ;;  %v4083_v40 = vpop.permute.xlu1 %2526 }
 0x122   : > { %1590 = vmatprep.mubr.f32.mxu1 %v3815_v2  ;;  %1716 = vmatpush1.msra.mxu1 %v4012_v17 }
 0x123   : > { %1669 = vmatmul.mubr.f32.vlgmr.msra.gmra.mxu0 %v1488_v23  ;;  %1884 = vmatprep.subr.mxu1 %v4001_v16  ;;  %v273_v23 = vld [vmem:[%s3895_s9 + $0x8] sm:$0xff] }
 0x124   : > { %1674 = vmatprep.mubr.f32.mxu0 %v3815_v2  ;;  %1805 = vmatpush1.msra.mxu0 %v1547_v27  ;;  %v277_v32 = vmax.f32 %v273_v23, 0.0 }
 0x125   : > { %1592 = vmatmul.mubr.f32.gmra.mxu1 %v4026_v24  ;;  %v839_v46 = vpop.permute.xlu1 %838 }
 0x126   : > { %1749 = vmatprep.mubr.f32.mxu1 %v3815_v2 }
 0x127   : > { %1677 = vmatmul.mubr.f32.gmra.mxu0 %v1499_v29 }
 0x128   : > { %1838 = vmatprep.mubr.f32.mxu0 %v3815_v2 }
 0x129   : > { %1753 = vmatmul.mubr.f32.vlgmr.msra.gmra.mxu1 %v1489_v28 }
 0x12a   : > { %1758 = vmatprep.mubr.f32.mxu1 %v3815_v2  ;;  %1886 = vmatpush1.msra.mxu1 %v4012_v17 }
 0x12b   : > { %1840 = vmatmul.mubr.f32.vlgmr.msra.gmra.mxu0 %v4016_v19 }
 0x12c   : > { %1845 = vmatprep.mubr.f32.mxu0 %v3815_v2 }
 0x12d   : > { %1762 = vmatmul.mubr.f32.gmra.mxu1 %v1500_v34 }
 0x12e   : > { %1919 = vmatprep.mubr.f32.mxu1 %v3815_v2 }
 0x12f   : > { %1847 = vmatmul.mubr.f32.gmra.mxu0 %v4026_v24 }
 0x130   : > { %2036 = vmatprep.mubr.f32.mxu0 %v3815_v2 }
 0x131   : > { %1921 = vmatmul.mubr.f32.vlgmr.msra.gmra.mxu1 %v4016_v19 }
 0x132   : > { %1926 = vmatprep.mubr.f32.mxu1 %v3815_v2 }
 0x135   : > { %1928 = vmatmul.mubr.f32.gmra.mxu1 %v4026_v24 }
 0x136   : > { %2143 = vmatprep.mubr.f32.mxu1 %v3815_v2 }
 0x1c0   : > { %v923_v39 = vpop.f32.mrf.mxu0 }
 0x1c1   : > { %v924_v45 = vadd.f32 %v923_v39, %v834_v43 }
 0x1c2   : > { %v925_v41 = vpop.f32.mrf.mxu0 }
 0x1c3   : > { %v926_v49 = vadd.f32 %v925_v41, %v834_v43 }
 0x1c4   : > { %v934_v42 = vpop.f32.mrf.mxu0 }
 0x1c5   : > { %v935_v51 = vadd.f32 %v934_v42, %v839_v46 }
 0x1c6   : > { %v936_v44 = vpop.f32.mrf.mxu0 }
 0x1c7   : > { %v937_v58 = vadd.f32 %v936_v44, %v839_v46 }
 0x1c8   : > { %v1026_v47 = vpop.f32.mrf.mxu1  ;;  %v1114_v48 = vpop.f32.mrf.mxu0 }
 0x1c9   : > { %v1027_v50 = vadd.f32 %v1026_v47, %v924_v45 }
 0x1ca   : > { %v1028_v52 = vpop.f32.mrf.mxu1  ;;  %v1116_v53 = vpop.f32.mrf.mxu0 }
 0x1cb   : > { %v1029_v54 = vadd.f32 %v1028_v52, %v926_v49  ;;  %v1115_v55 = vadd.f32 %v1114_v48, %v1027_v50 }
 0x1cd   : > { %v1033_v56 = vpop.f32.mrf.mxu1  ;;  %v1117_v57 = vadd.f32 %v1116_v53, %v1029_v54 }
 0x1ce   : > { %v1034_v59 = vadd.f32 %v1033_v56, %v935_v51 }
 0x1cf   : > { %v1035_v60 = vpop.f32.mrf.mxu1  ;;  %v1122_v61 = vpop.f32.mrf.mxu0 }
 0x1d0   : > { %v1036_v62 = vadd.f32 %v1035_v60, %v937_v58  ;;  %v1123_v63 = vadd.f32 %v1122_v61, %v1034_v59  ;;  %v3747_v58 = vld [vmem:[%s4309_s3 + $0x10] sm:$0xff] }
 0x1d1   : > { %v1124_v1 = vpop.f32.mrf.mxu0  ;;  %v1200_v3 = vpop.f32.mrf.mxu1 }
 0x1d2   : > { %v1125_v4 = vadd.f32 %v1124_v1, %v1036_v62  ;;  %v1201_v5 = vadd.f32 %v1200_v3, %v1115_v55  ;;  %v1963_v3 = vsel %vm841_vm1, %v3747_v58, 0 }
 0x1d3   : > { %v1202_v6 = vpop.f32.mrf.mxu1  ;;  %v1293_v7 = vpop.f32.mrf.mxu0 }
 0x1d4   : > { %v1203_v8 = vadd.f32 %v1202_v6, %v1117_v57  ;;  %v1294_v16 = vadd.f32 %v1293_v7, %v1201_v5 }
 0x1d5   : > { %v1209_v10 = vpop.f32.mrf.mxu1  ;;  %v1295_v12 = vpop.f32.mrf.mxu0 }
 0x1d6   : > { %v1210_v13 = vadd.f32 %v1209_v10, %v1123_v63  ;;  %v1296_v14 = vadd.f32 %v1295_v12, %v1203_v8  ;;  %v4099_v10 = vand.u32 4294901760, %v1963_v3  ;;  %v3748_v12 = vld [vmem:[%s4309_s3 + $0x18] sm:$0xff] }
 0x1d7   : > { %v1211_v15 = vpop.f32.mrf.mxu1  ;;  %v1300_v17 = vpop.f32.mrf.mxu0 }
 0x1d8   : > { %v1212_v19 = vadd.f32 %v1211_v15, %v1125_v4  ;;  %v1301_v20 = vadd.f32 %v1300_v17, %v1210_v13  ;;  %v4106_v23 = vsub.f32 %v1963_v3, %v4099_v10 }
 0x1d9   : > { %v1302_v21 = vpop.f32.mrf.mxu0  ;;  %v1376_v22 = vpop.f32.mrf.mxu1 }
 0x1da   : > { %v1303_v24 = vadd.f32 %v1302_v21, %v1212_v19  ;;  %v1377_v27 = vadd.f32 %v1376_v22, %v1294_v16 }
 0x1db   : > { %v1378_v28 = vpop.f32.mrf.mxu1  ;;  %v1493_v29 = vpop.f32.mrf.mxu0 }
 0x1dc   : > { %v1388_v31 = vadd.f32 1.0, %v1377_v27  ;;  %v1379_v33 = vadd.f32 %v1378_v28, %v1296_v14  ;;  %v1494_v47 = vadd.f32 %v1493_v29, %v4079_v30 }
 0x1dd   : > { %v1383_v34 = vpop.f32.mrf.mxu1  ;;  %v1495_v25 = vpop.f32.mrf.mxu0 }
 0x1de   : > { %v1390_v35 = vmul.f32 %v1388_v31, %v276_v26  ;;  %v1389_v36 = vadd.f32 1.0, %v1379_v33  ;;  %v1384_v37 = vadd.f32 %v1383_v34, %v1301_v20  ;;  %v1496_v53 = vadd.f32 %v1495_v25, %v4079_v30 }
 0x1df   : > { %v1385_v39 = vpop.f32.mrf.mxu1  ;;  %v1504_v41 = vpop.f32.mrf.mxu0  ;;  %v1966_v20 = vsel %vm841_vm1, %v3748_v12, 0 }
 0x1e0   : > { %v1391_v42 = vmul.f32 %v1389_v36, %v277_v32  ;;  %v4087_v43 = vadd.f32 %v1390_v35, %v1384_v37  ;;  %v1386_v44 = vadd.f32 %v1385_v39, %v1303_v24  ;;  %v1505_v54 = vadd.f32 %v1504_v41, %v4077_v11 }
 0x1e1   : > { %v1506_v45 = vpop.f32.mrf.mxu0  ;;  %v1586_v46 = vpop.f32.mrf.mxu1  ;;  %v4108_v29 = vand.u32 4294901760, %v1966_v20  ;;  %v2039_v35 = vand.u32 4294901760, %v4106_v23 }
 0x1e2   : > { %v4090_v48 = vadd.f32 %v1391_v42, %v1386_v44  ;;  %v1587_v55 = vadd.f32 %v1586_v46, %v1494_v47  ;;  %v1507_v60 = vadd.f32 %v1506_v45, %v4077_v11 }
 0x1e3   : > { %v1588_v49 = vpop.f32.mrf.mxu1  ;;  %v1670_v50 = vpop.f32.mrf.mxu0  ;;  %v4114_v44 = vsub.f32 %v1966_v20, %v4108_v29 }
 0x1e4   : > { %v1589_v59 = vadd.f32 %v1588_v49, %v1496_v53  ;;  %v1671_v63 = vadd.f32 %v1670_v50, %v1587_v55 }
 0x1e5   : > { %v1593_v51 = vpop.f32.mrf.mxu1  ;;  %v1672_v52 = vpop.f32.mrf.mxu0  ;;  %v2050_v55 = vand.u32 4294901760, %v4114_v44 }
 0x1e6   : > { %v1594_v1 = vadd.f32 %v1593_v51, %v1505_v54  ;;  %v1673_v6 = vadd.f32 %v1672_v52, %v1589_v59  ;;  %v2040_v52 = vsub.f32 %v4106_v23, %v2039_v35 }
 0x1e7   : > { %v1595_v56 = vpop.f32.mrf.mxu1  ;;  %v1678_v57 = vpop.f32.mrf.mxu0 }
 0x1e8   : > { %v1596_v4 = vadd.f32 %v1595_v56, %v1507_v60  ;;  %v1679_v11 = vadd.f32 %v1678_v57, %v1594_v1  ;;  %v2041_v60 = vand.u32 4294901760, %v2040_v52 }
 0x1e9   : > { %v1680_v61 = vpop.f32.mrf.mxu0  ;;  %v1754_v62 = vpop.f32.mrf.mxu1 }
 0x1ea   : > { %v1755_v7 = vadd.f32 %v1754_v62, %v1671_v63  ;;  %v1681_v14 = vadd.f32 %v1680_v61, %v1596_v4  ;;  %v2051_v62 = vsub.f32 %v4114_v44, %v2050_v55 }
 0x1eb   : > { %v1756_v30 = vpop.f32.mrf.mxu1  ;;  %v1841_v5 = vpop.f32.mrf.mxu0 }
 0x1ec   : > { %v1757_v13 = vadd.f32 %v1756_v30, %v1673_v6  ;;  %v1842_v18 = vadd.f32 %v1841_v5, %v1755_v7  ;;  %v4134_v5 = vmax.f32 %v3993_v0, 0.0  ;;  %v3751_v6 = vld [vmem:[%s4307_s1 + $0x20] sm:$0xff]  ;;  %v2052_v7 = vand.u32 4294901760, %v2051_v62 }
 0x1ed   : > { %v1763_v8 = vpop.f32.mrf.mxu1  ;;  %v1843_v16 = vpop.f32.mrf.mxu0 }
 0x1ee   : > { %v1764_v19 = vadd.f32 %v1763_v8, %v1679_v11  ;;  %v1844_v24 = vadd.f32 %v1843_v16, %v1757_v13  ;;  %v2535_v13 = vsel %vm294_vm0, %v3751_v6, 0 }
 0x1ef   : > { %v1765_v15 = vpop.f32.mrf.mxu1  ;;  %v1848_v17 = vpop.f32.mrf.mxu0  ;;  %v4150_v20 = vand.u32 4294901760, %v2535_v13 }
 0x1f0   : > { %v1766_v21 = vadd.f32 %v1765_v15, %v1681_v14  ;;  %v1849_v31 = vadd.f32 %v1848_v17, %v1764_v19  ;;  %v4142_v14 = vand.u32 4294901760, %v4134_v5  ;;  %v4145_v15 = vmax.f32 %v4004_v9, 0.0  ;;  %v3752_v17 = vld [vmem:[%s4307_s1 + $0x28] sm:$0xff] }
 0x1f1   : > { %v1922_v22 = vpop.f32.mrf.mxu1  ;;  %v1850_v26 = vpop.f32.mrf.mxu0 }
 0x1f2   : > { %v1923_v27 = vadd.f32 %v1922_v22, %v1842_v18  ;;  %v1851_v34 = vadd.f32 %v1850_v26, %v1766_v21  ;;  %v2538_v21 = vsel %vm294_vm0, %v3752_v17, 0  ;;  %v4155_v9 = vand.u32 4294901760, %v4145_v15 }
 0x1f3   : > { %v1924_v28 = vpop.f32.mrf.mxu1  ;;  %v2660_v22 = vsub.f32 %v4134_v5, %v4142_v14  ;;  %v4164_v26 = vand.u32 4294901760, %v2538_v21 }
 0x1f4   : > { %vm1934_vm6 = vcmp.ge.f32.partialorder %v1923_v27, 0.0  ;;  %v1938_v32 = vmul.f32 0.1, %v1923_v27  ;;  %v1925_v33 = vadd.f32 %v1924_v28, %v1844_v24  ;;  %v4162_v24 = vsub.f32 %v2535_v13, %v4150_v20 }
 0x1f5   : > { %v1929_v25 = vpop.f32.mrf.mxu1  ;;  %v2666_v28 = vsub.f32 %v4145_v15, %v4155_v9 }
 0x1f6   : > { %v1942_v36 = vsel %vm1934_vm6, %v1923_v27, %v1938_v32  ;;  %vm1935_vm7 = vcmp.ge.f32.partialorder %v1925_v33, 0.0  ;;  %v1939_v37 = vmul.f32 0.1, %v1925_v33  ;;  %v1930_v39 = vadd.f32 %v1929_v25, %v1849_v31 }
 0x1f7   : > { %v4111_v41 = vand.u32 4294901760, %v1942_v36  ;;  %v1931_v42 = vpop.f32.mrf.mxu1  ;;  %v2661_v27 = vand.u32 4294901760, %v2660_v22  ;;  %v2609_v31 = vand.u32 4294901760, %v4162_v24  ;;  %v2619_v32 = vsub.f32 %v2538_v21, %v4164_v26 }
 0x1f8   : > { %v1943_v45 = vsel %vm1935_vm7, %v1925_v33, %v1939_v37  ;;  %vm1936_vm8 = vcmp.ge.f32.partialorder %v1930_v39, 0.0  ;;  %v1940_v46 = vmul.f32 0.1, %v1930_v39  ;;  %v1932_v47 = vadd.f32 %v1931_v42, %v1851_v34 }
 0x1f9   : > { %v4116_v49 = vand.u32 4294901760, %v1943_v45  ;;  %v2106_v56 = vsub.f32 %v1942_v36, %v4111_v41  ;;  %v2662_v33 = vsub.f32 %v2660_v22, %v2661_v27  ;;  %v2667_v34 = vand.u32 4294901760, %v2666_v28 }
 0x1fa   : > { %v1944_v50 = vsel %vm1936_vm8, %v1930_v39, %v1940_v46  ;;  %vm1937_vm9 = vcmp.ge.f32.partialorder %v1932_v47, 0.0  ;;  %v1941_v51 = vmul.f32 0.1, %v1932_v47  ;;  %v2610_v25 = vsub.f32 %v4162_v24, %v2609_v31 }
 0x1fb   : > { %v4121_v53 = vand.u32 4294901760, %v1944_v50  ;;  %v2100_v54 = vsub.f32 %v1943_v45, %v4116_v49  ;;  %v2107_v3 = vand.u32 4294901760, %v2106_v56  ;;  %v2620_v36 = vand.u32 4294901760, %v2619_v32 }
 0x1fc   : > { %v1945_v57 = vsel %vm1937_vm9, %v1932_v47, %v1941_v51  ;;  %v2663_v37 = vand.u32 4294901760, %v2662_v33  ;;  %v2668_v39 = vsub.f32 %v2666_v28, %v2667_v34  ;;  %v2611_v42 = vand.u32 4294901760, %v2610_v25 }
 0x1fd   : > { %v2094_v58 = vsub.f32 %v1944_v50, %v4121_v53  ;;  %v1996_v59 = vand.u32 4294901760, %v1945_v57  ;;  %v2101_v1 = vand.u32 4294901760, %v2100_v54  ;;  %v2108_v12 = vsub.f32 %v2106_v56, %v2107_v3 }
 0x1fe   : > { %v2621_v45 = vsub.f32 %v2619_v32, %v2620_v36  ;;  %v1394_v33 = vmax.f32 %v4087_v43, 0.0 }
 0x1ff   : > { %1997 = vmatprep.subr.mxu0 %v1996_v59  ;;  %v2088_v61 = vsub.f32 %v1945_v57, %v1996_v59  ;;  %v2095_v63 = vand.u32 4294901760, %v2094_v58  ;;  %v2102_v16 = vsub.f32 %v2100_v54, %v2101_v1  ;;  %v2109_v19 = vand.u32 4294901760, %v2108_v12  ;;  %v1960_v57 = vpop.permute.xlu1 %1959 }
 0x200   : > { %1999 = vmatpush1.msra.mxu0 %v4121_v53 }
 0x201   : > { %2001 = vmatprep.subr.mxu0 %v4116_v49  ;;  %v2089_v4 = vand.u32 4294901760, %v2088_v61  ;;  %v2096_v30 = vsub.f32 %v2094_v58, %v2095_v63  ;;  %v2103_v18 = vand.u32 4294901760, %v2102_v16 }
 0x202   : > { %2003 = vmatpush1.msra.mxu0 %v4111_v41 }
 0x203   : > { %2042 = vmatmul.mubr.f32.vlgmr.msra.gmra.mxu0 %v2041_v60  ;;  %2188 = vmatprep.subr.mxu0 %v2088_v61  ;;  %v2090_v8 = vsub.f32 %v2088_v61, %v2089_v4  ;;  %v2097_v0 = vand.u32 4294901760, %v2096_v30 }
 0x204   : > { %2191 = vmatpush1.msra.mxu0 %v2094_v58  ;;  %2047 = vmatprep.mubr.f32.mxu0 %v3815_v2 }
 0x205   : > { %2194 = vmatprep.subr.mxu0 %v2100_v54  ;;  %v2091_v11 = vand.u32 4294901760, %v2090_v8 }
 0x206   : > { %2197 = vmatpush1.msra.mxu0 %v2106_v56 }
 0x207   : > { %2053 = vmatmul.mubr.f32.gmra.mxu0 %v2052_v7  ;;  %2092 = vmatprep.subr.mxu1 %v2091_v11 }
 0x208   : > { %2365 = vmatprep.subr.mxu0 %v2089_v4  ;;  %2098 = vmatpush1.msra.mxu1 %v2097_v0 }
 0x209   : > { %2104 = vmatprep.subr.mxu1 %v2103_v18  ;;  %2230 = vmatprep.mubr.f32.mxu0 %v3815_v2 }
 0x20a   : > { %2110 = vmatpush1.msra.mxu1 %v2109_v19 }
 0x20b   : > { %2145 = vmatmul.mubr.f32.vlgmr.msra.gmra.mxu1 %v4099_v10  ;;  %2233 = vmatmul.mubr.f32.vlgmr.msra.gmra.mxu0 %v4106_v23  ;;  %v2669_v23 = vand.u32 4294901760, %v2668_v39  ;;  %v1395_v39 = vmax.f32 %v4090_v48, 0.0 }
 0x20c   : > { %2276 = vmatprep.subr.mxu1 %v1996_v59  ;;  %2369 = vmatpush1.msra.mxu0 %v2095_v63 }
 0x20d   : > { %2278 = vmatpush1.msra.mxu1 %v4121_v53  ;;  %2373 = vmatprep.subr.mxu0 %v2101_v1 }
 0x20e   : > { %2280 = vmatprep.subr.mxu1 %v4116_v49  ;;  %2377 = vmatpush1.msra.mxu0 %v2107_v3 }
 0x20f   : > { %2150 = vmatprep.mubr.f32.mxu1 %v3815_v2  ;;  %2238 = vmatprep.mubr.f32.mxu0 %v3815_v2 }
 0x210   : > { %2282 = vmatpush1.msra.mxu1 %v4111_v41  ;;  %2241 = vmatmul.mubr.f32.gmra.mxu0 %v4114_v44  ;;  %v1955_v44 = vpop.permute.xlu0 %1954 }
 0x211   : > { %2152 = vmatmul.mubr.f32.gmra.mxu1 %v4108_v29  ;;  %2454 = vmatprep.subr.mxu1 %v1996_v59 }
 0x212   : > { %2315 = vmatprep.mubr.f32.mxu1 %v3815_v2  ;;  %2410 = vmatprep.mubr.f32.mxu0 %v3815_v2 }
 0x213   : > { %2571 = vmatprep.subr.mxu0 %v4142_v14 }
 0x214   : > { %2412 = vmatmul.mubr.f32.vlgmr.msra.gmra.mxu0 %v4099_v10 }
 0x215   : > { %2319 = vmatmul.mubr.f32.vlgmr.msra.gmra.mxu1 %v2039_v35  ;;  %2417 = vmatprep.mubr.f32.mxu0 %v3815_v2  ;;  %v2622_v35 = vand.u32 4294901760, %v2621_v45 }
 0x216   : > { %2456 = vmatpush1.msra.mxu1 %v4121_v53  ;;  %2324 = vmatprep.mubr.f32.mxu1 %v3815_v2 }
 0x217   : > { %2458 = vmatprep.subr.mxu1 %v4116_v49  ;;  %2573 = vmatpush1.msra.mxu0 %v4155_v9 }
 0x218   : > { %2460 = vmatpush1.msra.mxu1 %v4111_v41  ;;  %2419 = vmatmul.mubr.f32.gmra.mxu0 %v4108_v29 }
 0x219   : > { %2328 = vmatmul.mubr.f32.gmra.mxu1 %v2050_v55  ;;  %2606 = vmatprep.mubr.f32.mxu0 %v3815_v2 }
 0x21a   : > { %2493 = vmatprep.mubr.f32.mxu1 %v3815_v2  ;;  %2664 = vmatprep.subr.mxu1 %v2663_v37 }
 0x21b   : > { %2750 = vmatprep.subr.mxu0 %v2660_v22 }
 0x21c   : > { %2612 = vmatmul.mubr.f32.vlgmr.msra.gmra.mxu0 %v2611_v42 }
 0x21d   : > { %2495 = vmatmul.mubr.f32.vlgmr.msra.gmra.mxu1 %v4099_v10  ;;  %2617 = vmatprep.mubr.f32.mxu0 %v3815_v2 }
 0x21e   : > { %2500 = vmatprep.mubr.f32.mxu1 %v3815_v2  ;;  %2670 = vmatpush1.msra.mxu1 %v2669_v23 }
 0x21f   : > { %2753 = vmatpush1.msra.mxu0 %v2666_v28  ;;  %2834 = vmatprep.subr.mxu1 %v4142_v14 }
 0x220   : > { %2623 = vmatmul.mubr.f32.gmra.mxu0 %v2622_v35  ;;  %2921 = vmatprep.subr.mxu0 %v2661_v27 }
 0x221   : > { %2502 = vmatmul.mubr.f32.gmra.mxu1 %v4108_v29  ;;  %2786 = vmatprep.mubr.f32.mxu0 %v3815_v2 }
 0x222   : > { %2703 = vmatprep.mubr.f32.mxu1 %v3815_v2 }
 0x224   : > { %2789 = vmatmul.mubr.f32.vlgmr.msra.gmra.mxu0 %v4162_v24 }
 0x225   : > { %2705 = vmatmul.mubr.f32.vlgmr.msra.gmra.mxu1 %v4150_v20  ;;  %2794 = vmatprep.mubr.f32.mxu0 %v3815_v2 }
 0x226   : > { %2710 = vmatprep.mubr.f32.mxu1 %v3815_v2  ;;  %2836 = vmatpush1.msra.mxu1 %v4155_v9 }
 0x227   : > { %2925 = vmatpush1.msra.mxu0 %v2667_v34  ;;  %3004 = vmatprep.subr.mxu1 %v4142_v14 }
 0x228   : > { %2797 = vmatmul.mubr.f32.gmra.mxu0 %v2619_v32 }
 0x229   : > { %2712 = vmatmul.mubr.f32.gmra.mxu1 %v4164_v26  ;;  %2958 = vmatprep.mubr.f32.mxu0 %v3815_v2 }
 0x22a   : > { %2869 = vmatprep.mubr.f32.mxu1 %v3815_v2 }
 0x22c   : > { %2960 = vmatmul.mubr.f32.vlgmr.msra.gmra.mxu0 %v4150_v20 }
 0x22d   : > { %2873 = vmatmul.mubr.f32.vlgmr.msra.gmra.mxu1 %v2609_v31  ;;  %2965 = vmatprep.mubr.f32.mxu0 %v3815_v2 }
 0x22e   : > { %2878 = vmatprep.mubr.f32.mxu1 %v3815_v2  ;;  %3006 = vmatpush1.msra.mxu1 %v4155_v9 }
 0x230   : > { %2967 = vmatmul.mubr.f32.gmra.mxu0 %v4164_v26 }
 0x231   : > { %2882 = vmatmul.mubr.f32.gmra.mxu1 %v2620_v36  ;;  %3156 = vmatprep.mubr.f32.mxu0 %v3815_v2 }
 0x232   : > { %3039 = vmatprep.mubr.f32.mxu1 %v3815_v2 }
 0x235   : > { %3041 = vmatmul.mubr.f32.vlgmr.msra.gmra.mxu1 %v4150_v20 }
 0x236   : > { %3046 = vmatprep.mubr.f32.mxu1 %v3815_v2 }
 0x239   : > { %3048 = vmatmul.mubr.f32.gmra.mxu1 %v4164_v26 }
 0x23a   : > { %3263 = vmatprep.mubr.f32.mxu1 %v3815_v2 }
 0x2c3   : > { %v2043_v10 = vpop.f32.mrf.mxu0 }
 0x2c4   : > { %v2044_v47 = vadd.f32 %v2043_v10, %v1955_v44 }
 0x2c5   : > { %v2045_v29 = vpop.f32.mrf.mxu0 }
 0x2c6   : > { %v2046_v51 = vadd.f32 %v2045_v29, %v1955_v44 }
 0x2c7   : > { %v2054_v41 = vpop.f32.mrf.mxu0 }
 0x2c8   : > { %v2055_v58 = vadd.f32 %v2054_v41, %v1960_v57 }
 0x2c9   : > { %v2056_v46 = vpop.f32.mrf.mxu0 }
 0x2ca   : > { %v2057_v62 = vadd.f32 %v2056_v46, %v1960_v57  ;;  %v3755_v57 = vld [vmem:[%s4309_s3 + $0x20] sm:$0xff] }
 0x2cb   : > { %v2146_v49 = vpop.f32.mrf.mxu1  ;;  %v2234_v50 = vpop.f32.mrf.mxu0 }
 0x2cc   : > { %v2147_v52 = vadd.f32 %v2146_v49, %v2044_v47 }
 0x2cd   : > { %v2148_v53 = vpop.f32.mrf.mxu1  ;;  %v2236_v54 = vpop.f32.mrf.mxu0 }
 0x2ce   : > { %v2235_v55 = vadd.f32 %v2234_v50, %v2147_v52  ;;  %v2149_v56 = vadd.f32 %v2148_v53, %v2046_v51 }
 0x2d0   : > { %v2237_v59 = vadd.f32 %v2236_v54, %v2149_v56  ;;  %v2242_v60 = vpop.f32.mrf.mxu0 }
 0x2d1   : > { %v2153_v61 = vpop.f32.mrf.mxu1 }
 0x2d2   : > { %v2154_v63 = vadd.f32 %v2153_v61, %v2055_v58  ;;  %v2244_v1 = vpop.f32.mrf.mxu0 }
 0x2d3   : > { %v2155_v3 = vpop.f32.mrf.mxu1 }
 0x2d4   : > { %v2243_v4 = vadd.f32 %v2242_v60, %v2154_v63  ;;  %v2156_v30 = vadd.f32 %v2155_v3, %v2057_v62  ;;  %v2413_v6 = vpop.f32.mrf.mxu0 }
 0x2d5   : > { %v2320_v7 = vpop.f32.mrf.mxu1 }
 0x2d6   : > { %v2245_v8 = vadd.f32 %v2244_v1, %v2156_v30  ;;  %v2321_v16 = vadd.f32 %v2320_v7, %v2235_v55  ;;  %v2415_v12 = vpop.f32.mrf.mxu0 }
 0x2d7   : > { %v2322_v11 = vpop.f32.mrf.mxu1 }
 0x2d8   : > { %v2414_v13 = vadd.f32 %v2413_v6, %v2321_v16  ;;  %v2323_v0 = vadd.f32 %v2322_v11, %v2237_v59  ;;  %v2420_v14 = vpop.f32.mrf.mxu0 }
 0x2d9   : > { %v2329_v17 = vpop.f32.mrf.mxu1 }
 0x2da   : > { %v2416_v18 = vadd.f32 %v2415_v12, %v2323_v0  ;;  %v2330_v19 = vadd.f32 %v2329_v17, %v2243_v4  ;;  %v2422_v20 = vpop.f32.mrf.mxu0  ;;  %v3083_v4 = vsel %vm841_vm1, %v3755_v57, 0  ;;  %v3756_v12 = vld [vmem:[%s4309_s3 + $0x28] sm:$0xff] }
 0x2db   : > { %v2331_v21 = vpop.f32.mrf.mxu1  ;;  %v4236_v16 = vand.u32 4294901760, %v3083_v4 }
 0x2dc   : > { %v2421_v9 = vadd.f32 %v2420_v14, %v2330_v19  ;;  %v2332_v22 = vadd.f32 %v2331_v21, %v2245_v8  ;;  %v2613_v24 = vpop.f32.mrf.mxu0  ;;  %v3086_v19 = vsel %vm841_vm1, %v3756_v12, 0 }
 0x2dd   : > { %v2496_v26 = vpop.f32.mrf.mxu1  ;;  %v2614_v51 = vadd.f32 %v2613_v24, %v4083_v40 }
 0x2de   : > { %v2423_v27 = vadd.f32 %v2422_v20, %v2332_v22  ;;  %v2497_v28 = vadd.f32 %v2496_v26, %v2414_v13  ;;  %v2615_v31 = vpop.f32.mrf.mxu0 }
 0x2df   : > { %v2498_v32 = vpop.f32.mrf.mxu1  ;;  %v2616_v48 = vadd.f32 %v2615_v31, %v4083_v40 }
 0x2e0   : > { %v2508_v34 = vadd.f32 1.0, %v2497_v28  ;;  %v2499_v25 = vadd.f32 %v2498_v32, %v2416_v18  ;;  %v2624_v36 = vpop.f32.mrf.mxu0  ;;  %v4245_v28 = vand.u32 4294901760, %v3086_v19 }
 0x2e1   : > { %v2503_v37 = vpop.f32.mrf.mxu1  ;;  %v2625_v58 = vadd.f32 %v2624_v36, %v4081_v38 }
 0x2e2   : > { %v2510_v42 = vmul.f32 %v2508_v34, %v1394_v33  ;;  %v2509_v45 = vadd.f32 1.0, %v2499_v25  ;;  %v2504_v23 = vadd.f32 %v2503_v37, %v2421_v9  ;;  %v2626_v35 = vpop.f32.mrf.mxu0  ;;  %v4243_v9 = vsub.f32 %v3083_v4, %v4236_v16 }
 0x2e3   : > { %v2505_v10 = vpop.f32.mrf.mxu1  ;;  %v2627_v61 = vadd.f32 %v2626_v35, %v4081_v38  ;;  %v4251_v35 = vsub.f32 %v3086_v19, %v4245_v28  ;;  %v3075_v19 = vpop.permute.xlu0 %3074 }
 0x2e4   : > { %v2511_v29 = vmul.f32 %v2509_v45, %v1395_v39  ;;  %v4224_v41 = vadd.f32 %v2510_v42, %v2504_v23  ;;  %v2506_v44 = vadd.f32 %v2505_v10, %v2423_v27  ;;  %v2790_v46 = vpop.f32.mrf.mxu0  ;;  %v3159_v36 = vand.u32 4294901760, %v4243_v9 }
 0x2e5   : > { %v2706_v47 = vpop.f32.mrf.mxu1 }
 0x2e6   : > { %v4226_v49 = vadd.f32 %v2511_v29, %v2506_v44  ;;  %v2792_v43 = vpop.f32.mrf.mxu0  ;;  %v2707_v54 = vadd.f32 %v2706_v47, %v2614_v51 }
 0x2e7   : > { %v2708_v50 = vpop.f32.mrf.mxu1 }
 0x2e8   : > { %v2798_v52 = vpop.f32.mrf.mxu0  ;;  %v2709_v59 = vadd.f32 %v2708_v50, %v2616_v48  ;;  %v2791_v63 = vadd.f32 %v2790_v46, %v2707_v54  ;;  %v3160_v50 = vsub.f32 %v4243_v9, %v3159_v36 }
 0x2e9   : > { %v2713_v53 = vpop.f32.mrf.mxu1 }
 0x2ea   : > { %v2800_v55 = vpop.f32.mrf.mxu0  ;;  %v2714_v1 = vadd.f32 %v2713_v53, %v2625_v58  ;;  %v2793_v6 = vadd.f32 %v2792_v43, %v2709_v59  ;;  %v3170_v53 = vand.u32 4294901760, %v4251_v35  ;;  %v3161_v57 = vand.u32 4294901760, %v3160_v50 }
 0x2eb   : > { %v2715_v56 = vpop.f32.mrf.mxu1 }
 0x2ec   : > { %v2961_v60 = vpop.f32.mrf.mxu0  ;;  %v2716_v40 = vadd.f32 %v2715_v56, %v2627_v61  ;;  %v2799_v11 = vadd.f32 %v2798_v52, %v2714_v1  ;;  %v3171_v59 = vsub.f32 %v4251_v35, %v3170_v53 }
 0x2ed   : > { %v2874_v62 = vpop.f32.mrf.mxu1 }
 0x2ee   : > { %v2963_v3 = vpop.f32.mrf.mxu0  ;;  %v2875_v7 = vadd.f32 %v2874_v62, %v2791_v63  ;;  %v2801_v0 = vadd.f32 %v2800_v55, %v2716_v40 }
 0x2ef   : > { %v2876_v30 = vpop.f32.mrf.mxu1 }
 0x2f0   : > { %v2877_v13 = vadd.f32 %v2876_v30, %v2793_v6  ;;  %v2968_v38 = vpop.f32.mrf.mxu0  ;;  %v2962_v17 = vadd.f32 %v2961_v60, %v2875_v7 }
 0x2f1   : > { %v2883_v8 = vpop.f32.mrf.mxu1 }
 0x2f2   : > { %v2884_v18 = vadd.f32 %v2883_v8, %v2799_v11  ;;  %v2964_v22 = vadd.f32 %v2963_v3, %v2877_v13  ;;  %v2970_v24 = vpop.f32.mrf.mxu0  ;;  %v3172_v3 = vand.u32 4294901760, %v3171_v59 }
 0x2f3   : > { %v2885_v14 = vpop.f32.mrf.mxu1 }
 0x2f4   : > { %v2886_v20 = vadd.f32 %v2885_v14, %v2801_v0  ;;  %v2969_v31 = vadd.f32 %v2968_v38, %v2884_v18 }
 0x2f5   : > { %v3042_v21 = vpop.f32.mrf.mxu1 }
 0x2f6   : > { %v3043_v26 = vadd.f32 %v3042_v21, %v2962_v17  ;;  %v2971_v34 = vadd.f32 %v2970_v24, %v2886_v20 }
 0x2f7   : > { %v3044_v27 = vpop.f32.mrf.mxu1 }
 0x2f8   : > { %vm3054_vm10 = vcmp.ge.f32.partialorder %v3043_v26, 0.0  ;;  %v3058_v32 = vmul.f32 0.1, %v3043_v26  ;;  %v3045_v33 = vadd.f32 %v3044_v27, %v2964_v22  ;;  %v3080_v22 = vpop.permute.xlu1 %3079 }
 0x2f9   : > { %v3049_v25 = vpop.f32.mrf.mxu1 }
 0x2fa   : > { %v3062_v37 = vsel %vm3054_vm10, %v3043_v26, %v3058_v32  ;;  %vm3055_vm11 = vcmp.ge.f32.partialorder %v3045_v33, 0.0  ;;  %v3059_v39 = vmul.f32 0.1, %v3045_v33  ;;  %v3050_v42 = vadd.f32 %v3049_v25, %v2969_v31 }
 0x2fb   : > { %v4248_v45 = vand.u32 4294901760, %v3062_v37  ;;  %v3051_v23 = vpop.f32.mrf.mxu1 }
 0x2fc   : > { %v3063_v10 = vsel %vm3055_vm11, %v3045_v33, %v3059_v39  ;;  %vm3056_vm12 = vcmp.ge.f32.partialorder %v3050_v42, 0.0  ;;  %v3060_v29 = vmul.f32 0.1, %v3050_v42  ;;  %v3052_v44 = vadd.f32 %v3051_v23, %v2971_v34 }
 0x2fd   : > { %v4253_v46 = vand.u32 4294901760, %v3063_v10  ;;  %v3226_v48 = vsub.f32 %v3062_v37, %v4248_v45 }
 0x2fe   : > { %v3064_v47 = vsel %vm3056_vm12, %v3050_v42, %v3060_v29  ;;  %vm3057_vm13 = vcmp.ge.f32.partialorder %v3052_v44, 0.0  ;;  %v3061_v43 = vmul.f32 0.1, %v3052_v44 }
 0x2ff   : > { %v3118_v51 = vand.u32 4294901760, %v3064_v47  ;;  %v3220_v52 = vsub.f32 %v3063_v10, %v4253_v46  ;;  %v3227_v62 = vand.u32 4294901760, %v3226_v48 }
 0x300   : > { %v3065_v54 = vsel %vm3057_vm13, %v3052_v44, %v3061_v43 }
 0x301   : > { %v3214_v55 = vsub.f32 %v3064_v47, %v3118_v51  ;;  %v3116_v56 = vand.u32 4294901760, %v3065_v54  ;;  %v3221_v61 = vand.u32 4294901760, %v3220_v52  ;;  %v3228_v30 = vsub.f32 %v3226_v48, %v3227_v62 }
 0x303   : > { %3117 = vmatprep.subr.mxu0 %v3116_v56  ;;  %v3208_v58 = vsub.f32 %v3065_v54, %v3116_v56  ;;  %v3215_v60 = vand.u32 4294901760, %v3214_v55  ;;  %v3222_v40 = vsub.f32 %v3220_v52, %v3221_v61  ;;  %v3229_v12 = vand.u32 4294901760, %v3228_v30 }
 0x304   : > { %3119 = vmatpush1.msra.mxu0 %v3118_v51 }
 0x305   : > { %3121 = vmatprep.subr.mxu0 %v4253_v46  ;;  %v3209_v63 = vand.u32 4294901760, %v3208_v58  ;;  %v3216_v1 = vsub.f32 %v3214_v55, %v3215_v60  ;;  %v3223_v8 = vand.u32 4294901760, %v3222_v40 }
 0x306   : > { %3123 = vmatpush1.msra.mxu0 %v4248_v45 }
 0x307   : > { %3162 = vmatmul.mubr.f32.vlgmr.msra.gmra.mxu0 %v3161_v57  ;;  %3308 = vmatprep.subr.mxu0 %v3208_v58  ;;  %v3210_v4 = vsub.f32 %v3208_v58, %v3209_v63  ;;  %v3217_v7 = vand.u32 4294901760, %v3216_v1 }
 0x308   : > { %3311 = vmatpush1.msra.mxu0 %v3214_v55  ;;  %3167 = vmatprep.mubr.f32.mxu0 %v3815_v2 }
 0x309   : > { %3314 = vmatprep.subr.mxu0 %v3220_v52  ;;  %v3211_v6 = vand.u32 4294901760, %v3210_v4 }
 0x30a   : > { %3317 = vmatpush1.msra.mxu0 %v3226_v48 }
 0x30b   : > { %3173 = vmatmul.mubr.f32.gmra.mxu0 %v3172_v3  ;;  %3212 = vmatprep.subr.mxu1 %v3211_v6 }
 0x30c   : > { %3485 = vmatprep.subr.mxu0 %v3209_v63  ;;  %3218 = vmatpush1.msra.mxu1 %v3217_v7 }
 0x30d   : > { %3224 = vmatprep.subr.mxu1 %v3223_v8  ;;  %3350 = vmatprep.mubr.f32.mxu0 %v3815_v2 }
 0x30e   : > { %3230 = vmatpush1.msra.mxu1 %v3229_v12 }
 0x30f   : > { %3265 = vmatmul.mubr.f32.vlgmr.msra.gmra.mxu1 %v4236_v16  ;;  %3353 = vmatmul.mubr.f32.vlgmr.msra.gmra.mxu0 %v4243_v9 }
 0x310   : > { %3396 = vmatprep.subr.mxu1 %v3116_v56  ;;  %3489 = vmatpush1.msra.mxu0 %v3215_v60  ;;  %v2515_v60 = vmax.f32 %v4226_v49, 0.0  ;;  %v3637_v49 = vmax.f32 %v4134_v5, 0.0 }
 0x311   : > { %3398 = vmatpush1.msra.mxu1 %v3118_v51  ;;  %3493 = vmatprep.subr.mxu0 %v3221_v61 }
 0x312   : > { %3400 = vmatprep.subr.mxu1 %v4253_v46  ;;  %3497 = vmatpush1.msra.mxu0 %v3227_v62  ;;  %3641 = vst [vmem:[%s269_s13 + $0x18] sm:$0xff] %v3637_v49 }
 0x313   : > { %3270 = vmatprep.mubr.f32.mxu1 %v3815_v2  ;;  %3402 = vmatpush1.msra.mxu1 %v4248_v45 }
 0x314   : > { %3272 = vmatmul.mubr.f32.gmra.mxu1 %v4245_v28  ;;  %3574 = vmatprep.subr.mxu1 %v3116_v56  ;;  %v2514_v56 = vmax.f32 %v4224_v41, 0.0  ;;  %v3636_v41 = vmax.f32 %v4145_v15, 0.0 }
 0x315   : > { %3358 = vmatprep.mubr.f32.mxu0 %v3815_v2  ;;  %3435 = vmatprep.mubr.f32.mxu1 %v3815_v2 }
 0x316   : > { %3361 = vmatmul.mubr.f32.gmra.mxu0 %v4251_v35  ;;  %3640 = vst [vmem:[%s269_s13 + $0x10] sm:$0xff] %v3636_v41 }
 0x317   : > { %3530 = vmatprep.mubr.f32.mxu0 %v3815_v2 }
 0x318   : > { %3439 = vmatmul.mubr.f32.vlgmr.msra.gmra.mxu1 %v3159_v36 }
 0x319   : > { %3576 = vmatpush1.msra.mxu1 %v3118_v51  ;;  %3444 = vmatprep.mubr.f32.mxu1 %v3815_v2 }
 0x31a   : > { %3578 = vmatprep.subr.mxu1 %v4253_v46  ;;  %3532 = vmatmul.mubr.f32.vlgmr.msra.gmra.mxu0 %v4236_v16 }
 0x31b   : > { %3580 = vmatpush1.msra.mxu1 %v4248_v45  ;;  %3537 = vmatprep.mubr.f32.mxu0 %v3815_v2 }
 0x31c   : > { %3448 = vmatmul.mubr.f32.gmra.mxu1 %v3170_v53 }
 0x31d   : > { %3613 = vmatprep.mubr.f32.mxu1 %v3815_v2 }
 0x31e   : > { %3539 = vmatmul.mubr.f32.gmra.mxu0 %v4245_v28 }
 0x320   : > { %3615 = vmatmul.mubr.f32.vlgmr.msra.gmra.mxu1 %v4236_v16 }
 0x321   : > { %3620 = vmatprep.mubr.f32.mxu1 %v3815_v2 }
 0x324   : > { %3622 = vmatmul.mubr.f32.gmra.mxu1 %v4245_v28 }
 0x3c7   : > { %v3163_v11 = vpop.f32.mrf.mxu0 }
 0x3c8   : > { %v3164_v21 = vadd.f32 %v3163_v11, %v3075_v19 }
 0x3c9   : > { %v3165_v13 = vpop.f32.mrf.mxu0 }
 0x3ca   : > { %v3166_v24 = vadd.f32 %v3165_v13, %v3075_v19 }
 0x3cb   : > { %v3174_v38 = vpop.f32.mrf.mxu0 }
 0x3cc   : > { %v3175_v31 = vadd.f32 %v3174_v38, %v3080_v22 }
 0x3cd   : > { %v3176_v0 = vpop.f32.mrf.mxu0 }
 0x3ce   : > { %v3177_v33 = vadd.f32 %v3176_v0, %v3080_v22 }
 0x3cf   : > { %v3266_v14 = vpop.f32.mrf.mxu1  ;;  %v3354_v17 = vpop.f32.mrf.mxu0 }
 0x3d0   : > { %v3267_v26 = vadd.f32 %v3266_v14, %v3164_v21 }
 0x3d1   : > { %v3268_v18 = vpop.f32.mrf.mxu1  ;;  %v3356_v20 = vpop.f32.mrf.mxu0 }
 0x3d2   : > { %v3269_v2 = vadd.f32 %v3268_v18, %v3166_v24  ;;  %v3355_v34 = vadd.f32 %v3354_v17, %v3267_v26 }
 0x3d4   : > { %v3273_v9 = vpop.f32.mrf.mxu1  ;;  %v3357_v39 = vadd.f32 %v3356_v20, %v3269_v2 }
 0x3d5   : > { %v3274_v25 = vadd.f32 %v3273_v9, %v3175_v31 }
 0x3d6   : > { %v3275_v27 = vpop.f32.mrf.mxu1  ;;  %v3362_v16 = vpop.f32.mrf.mxu0 }
 0x3d7   : > { %v3276_v42 = vadd.f32 %v3275_v27, %v3177_v33  ;;  %v3363_v10 = vadd.f32 %v3362_v16, %v3274_v25 }
 0x3d8   : > { %v3364_v32 = vpop.f32.mrf.mxu0  ;;  %v3440_v28 = vpop.f32.mrf.mxu1 }
 0x3d9   : > { %v3441_v45 = vadd.f32 %v3440_v28, %v3355_v34  ;;  %v3365_v47 = vadd.f32 %v3364_v32, %v3276_v42 }
 0x3da   : > { %v3442_v36 = vpop.f32.mrf.mxu1  ;;  %v3533_v37 = vpop.f32.mrf.mxu0 }
 0x3db   : > { %v3443_v29 = vadd.f32 %v3442_v36, %v3357_v39  ;;  %v3534_v43 = vadd.f32 %v3533_v37, %v3441_v45 }
 0x3dc   : > { %v3449_v23 = vpop.f32.mrf.mxu1  ;;  %v3535_v35 = vpop.f32.mrf.mxu0 }
 0x3dd   : > { %v3450_v50 = vadd.f32 %v3449_v23, %v3363_v10  ;;  %v3536_v52 = vadd.f32 %v3535_v35, %v3443_v29 }
 0x3de   : > { %v3451_v44 = vpop.f32.mrf.mxu1  ;;  %v3540_v46 = vpop.f32.mrf.mxu0 }
 0x3df   : > { %v3452_v53 = vadd.f32 %v3451_v44, %v3365_v47  ;;  %v3541_v57 = vadd.f32 %v3540_v46, %v3450_v50 }
 0x3e0   : > { %v3616_v51 = vpop.f32.mrf.mxu1  ;;  %v3542_v54 = vpop.f32.mrf.mxu0 }
 0x3e1   : > { %v3617_v48 = vadd.f32 %v3616_v51, %v3534_v43  ;;  %v3543_v62 = vadd.f32 %v3542_v54, %v3452_v53 }
 0x3e2   : > { %v3618_v55 = vpop.f32.mrf.mxu1 }
 0x3e3   : > { %v3628_v58 = vadd.f32 1.0, %v3617_v48  ;;  %v3619_v59 = vadd.f32 %v3618_v55, %v3536_v52 }
 0x3e4   : > { %v3623_v61 = vpop.f32.mrf.mxu1 }
 0x3e5   : > { %v3630_v63 = vmul.f32 %v3628_v58, %v2514_v56  ;;  %v3629_v1 = vadd.f32 1.0, %v3619_v59  ;;  %v3624_v3 = vadd.f32 %v3623_v61, %v3541_v57 }
 0x3e6   : > { %v3625_v4 = vpop.f32.mrf.mxu1 }
 0x3e7   : > { %v3631_v40 = vmul.f32 %v3629_v1, %v2515_v60  ;;  %v3632_v30 = vadd.f32 %v3630_v63, %v3624_v3  ;;  %v3626_v6 = vadd.f32 %v3625_v4, %v3543_v62 }
 0x3e9   : > { %v3634_v7 = vmax.f32 %v3632_v30, 0.0  ;;  %v3633_v8 = vadd.f32 %v3631_v40, %v3626_v6 }
 0x3eb   : > { %3638 = vst [vmem:[%s269_s13] sm:$0xff] %v3634_v7  ;;  %v3635_v12 = vmax.f32 %v3633_v8, 0.0 }
 0x3ed   : > { %3639 = vst [vmem:[%s269_s13 + $0x8] sm:$0xff] %v3635_v12 }
 0x3ee PF: > { %s15_s20 = sadd.s32 1, %s3813_s20   ;;  %s4312_s18 = smov %s3809_s19 }
 0x3ef   : > { %p12_p5 = scmp.ge.s32.totalorder %s15_s20, 4   ;;  %s4313_s19 = smov %s4315_s21 }
 0x3f1   :  { %14 = sbr.rel (!%p12_p5) target bundleno = 2 (0x2), region = 78 }

// kernel: atten_value_enh_pallas.3
= control target key start
LH: loop header
LB: loop body
LE: loop exit
PB: predicated region body
PF: predicated region fallthrough
CT: control target
= control target key end

     0   :  { %s317_s9 = smov 0   ;;  %s342_s0 = inlined_call_operand.vmem [shape: f32[2,3,256], index: 0, kind: input, shape index: {}]   ;;  %s343_s1 = inlined_call_operand.vmem [shape: f32[2,3,256], index: 1, kind: input, shape index: {}]   ;;  %s344_s2 = inlined_call_operand.vmem [shape: f32[2,3,256], index: 2, kind: output, shape index: {}]  }
   0x1 LB: > { %s265_s10 = sadd.s32 4294967295, %s300_s9   ;;  %p269_p0 = scmp.ge.s32.totalorder %s300_s9, 1  ;;  %s300_s9 = sphi %s317_s9, %s12_s9  }
   0x2   : > { %p122_p1 = scmp.lt.s32.totalorder %s300_s9, 3 }
   0x4   : > { %p123_p2 = pnand %p269_p0, %p122_p1 }
   0x5   : > { %p149_p3 = scmp.lt.s32.totalorder (!%p123_p2), %s265_s10, 1 }
   0x6   : > { %126 = sbr.rel (%p123_p2) target bundleno = 205 (0xcd), region = 28 }
   0xb   : > { %s346_s10 = smov (!%p149_p3, %s265_s10), 1  ;;  %vm169_vm0 = vcmask 1042432  }
   0xc   : > { %s325_s11 = sshll.u32 %s346_s10, 3 }
   0xd   : > { %s153_s14 = scalar_lea.vmem %s342_s0, %s325_s11  ;;  %s158_s17 = scalar_lea.vmem %s343_s1, %s325_s11 }
   0xe   : > { %v164_v0 = vld [vmem:[%s153_s14] sm:$0x77]  ;;  %s163_s20 = scalar_lea.vmem %s344_s2, %s325_s11 }
   0xf   : > { %v165_v1 = vmax.f32 %v164_v0, 0.0  ;;  %v183_v12 = vld [vmem:[%s158_s17] sm:$0x77] }
  0x10   : > { %v185_v13 = vcombine.high %v183_v12, %v183_v12 }
  0x11   : > { %v167_v2 = vcombine.high %v165_v1, %v165_v1  ;;  %v170_v3 = vsel %vm169_vm0, %v165_v1, 0.0 }
  0x13   : > { %v171_v4 = vsel %vm169_vm0, %v167_v2, 0.0 }
  0x14   : > { %v172_v5 = vadd.f32 %v171_v4, %v170_v3 }
  0x16   : > { %173 = vadd.xlane.f32.xlu0 %v172_v5 }
  0x9f   : > { %v174_v6 = vpop.xlane.xlu0 %173 }
  0xa0   : > { %v176_v7 = vmul.f32 0.00390625, %v174_v6 }
  0xa2   : > { %v177_v8 = vsub.f32 0.0, %v176_v7 }
  0xa4   : > { %v178_v9 = vmul.f32 1.442695, %v177_v8 }
  0xa6   : > { %290 = vpow2.f32 %v178_v9 }
  0xb3   : > { %v291_v10 = vpop.eup %290 }
  0xb4   : > { %v180_v11 = vadd.f32 1.0, %v291_v10 }
  0xb6   : > { %292 = vrcp.f32 %v180_v11 }
  0xc3   : > { %v293_v14 = vpop.eup %292 }
  0xc4   : > { %v187_v15 = vmul.f32 %v293_v14, %v183_v12  ;;  %v188_v16 = vmul.f32 %v293_v14, %v185_v13 }
  0xc6   : > { %v189_v17 = vadd.f32 1.0, %v187_v15  ;;  %v190_v18 = vadd.f32 1.0, %v188_v16 }
  0xc8   : > { %v191_v19 = vsub.f32 %v189_v17, %v293_v14  ;;  %v192_v20 = vsub.f32 %v190_v18, %v293_v14 }
  0xca   : > { %v195_v21 = vcombine.low %v191_v19, %v192_v20 }
  0xcc   : > { %197 = vst [vmem:[%s163_s20] sm:$0x77] %v195_v21 }
  0xcd PF: > { %s12_s9 = sadd.s32 1, %s300_s9  }
  0xce   : > { %p9_p4 = scmp.ge.s32.totalorder %s12_s9, 4  }
  0xd0   :  { %11 = sbr.rel (!%p9_p4) target bundleno = 1 (0x1), region = 61 }

</bundles_post_ra>
